<compile_context>
chip_gen: v7x
topology: tpu7x:2x2x1
jax: 0.10.0
libtpu: 0.0.40
codegen_flags: <defaults>
</compile_context>

<pallas_src>
import functools

import jax
import jax.numpy as jnp
from jax.experimental import pallas as pl
from jax.experimental.pallas import tpu as pltpu

EPS = 1e-5
NEG_INF = -1e30


def _bn_fold(h, gamma=None, beta=None):
    """BatchNorm1d (batch stats, biased var) folded into one scale/shift FMA."""
    inv_n = 1.0 / h.shape[0]
    s1 = jnp.sum(h, axis=0, keepdims=True)
    s2 = jnp.sum(h * h, axis=0, keepdims=True)
    mu = s1 * inv_n
    var = jnp.maximum(s2 * inv_n - mu * mu, 0.0)
    inv = jax.lax.rsqrt(var + EPS)             # EUP slot -> effectively free
    if gamma is not None:
        a = gamma * inv
        b = beta - mu * a
    else:
        a = inv
        b = -(mu * a)
    return h * a + b                            # single FMA over (B, F)


def dnn3_kernel(x_ref, w1_ref, g1_ref, b1_ref, w2_ref, g2_ref, b2_ref, w3_ref,
                o_ref, *, label_num):
    x = x_ref[...]                              # (B, S) f32

    # --- layer 1: fc1 (no bias) -> bn1 (affine) -> relu -------------------
    h = jnp.dot(x.astype(jnp.bfloat16), w1_ref[...],
                preferred_element_type=jnp.float32)
    h = jnp.maximum(_bn_fold(h, g1_ref[...], b1_ref[...]), 0.0)

    # --- layer 2: fc2 (no bias) -> bn2 (affine) -> relu -------------------
    h = jnp.dot(h.astype(jnp.bfloat16), w2_ref[...],
                preferred_element_type=jnp.float32)
    h = jnp.maximum(_bn_fold(h, g2_ref[...], b2_ref[...]), 0.0)

    # --- layer 3: fc3 (no bias, classes padded to 128) -> bn3 (no affine) --
    z = jnp.dot(h.astype(jnp.bfloat16), w3_ref[...],
                preferred_element_type=jnp.float32)
    z = _bn_fold(z)   # per-column stats, so padded (all-zero) cols don't
                      # perturb the real ones.

    # Mask the padded classes so they contribute 0 to the softmax denominator.
    col = jax.lax.broadcasted_iota(jnp.int32, z.shape, 1)
    z = jnp.where(col < label_num, z, NEG_INF)

    # log_softmax over dim=1 (classes), numerically stable.
    m = jnp.max(z, axis=1, keepdims=True)
    s = z - m
    lse = jnp.log(jnp.sum(jnp.exp(s), axis=1, keepdims=True))
    o_ref[...] = s - lse


def dnn3_forward(x, w1t, g1, b1, w2t, g2, b2, w3t):
    """x: (B, sample_size) f32; w*t pre-transposed to (in_features, out_features)."""
    B, S = x.shape
    H = w1t.shape[1]
    label_num = w3t.shape[1]
    c_pad = ((label_num + 127) // 128) * 128     # lane-dense class dim

    # bf16 weights: half the DMA bytes, native MXU dtype (f32 accumulation).
    w1b = w1t.astype(jnp.bfloat16)
    w2b = w2t.astype(jnp.bfloat16)
    w3b = jnp.zeros((H, c_pad), jnp.bfloat16).at[:, :label_num].set(
        w3t.astype(jnp.bfloat16))

    vmem = pl.BlockSpec(memory_space=pltpu.MemorySpace.VMEM)

    flops = 2 * B * (S * H + H * H + H * c_pad) + 10 * B * (2 * H + c_pad)
    transcendentals = B * c_pad + 3 * H + c_pad          # exp + rsqrt
    bytes_accessed = (x.size * 4 + w1b.size * 2 + w2b.size * 2 + w3b.size * 2
                      + (g1.size + b1.size + g2.size + b2.size) * 4
                      + B * c_pad * 4)

    out_pad = pl.pallas_call(
        functools.partial(dnn3_kernel, label_num=label_num),
        out_shape=jax.ShapeDtypeStruct((B, c_pad), jnp.float32),
        in_specs=[vmem] * 8,
        out_specs=vmem,
        cost_estimate=pl.CostEstimate(flops=flops,
                                      transcendentals=transcendentals,
                                      bytes_accessed=bytes_accessed),
        compiler_params=pltpu.CompilerParams(vmem_limit_bytes=64 << 20),
    )(x, w1b, g1, b1, w2b, g2, b2, w3b)

    return out_pad[:, :label_num]


# ----------------------------- references ---------------------------------

def reference_forward_mirror(x, w1t, g1, b1, w2t, g2, b2, w3t):
    """Pure-JAX mirror of the kernel math (bf16 matmuls, f32 elementwise)."""
    h = jnp.dot(x.astype(jnp.bfloat16), w1t.astype(jnp.bfloat16),
                preferred_element_type=jnp.float32)
    h = jnp.maximum(_bn_fold(h, g1, b1), 0.0)
    h = jnp.dot(h.astype(jnp.bfloat16), w2t.astype(jnp.bfloat16),
                preferred_element_type=jnp.float32)
    h = jnp.maximum(_bn_fold(h, g2, b2), 0.0)
    z = jnp.dot(h.astype(jnp.bfloat16), w3t.astype(jnp.bfloat16),
                preferred_element_type=jnp.float32)
    z = _bn_fold(z)
    return jax.nn.log_softmax(z, axis=1)


def reference_forward_f32(x, w1t, g1, b1, w2t, g2, b2, w3t):
    """Full-f32 reference matching the original PyTorch module semantics."""
    h = x @ w1t
    h = jnp.maximum(_bn_fold(h, g1, b1), 0.0)
    h = h @ w2t
    h = jnp.maximum(_bn_fold(h, g2, b2), 0.0)
    z = h @ w3t
    z = _bn_fold(z)
    return jax.nn.log_softmax(z, axis=1)


if __name__ == "__main__":
    # Small shapes consistent with the module's forward semantics.
    B = 128          # batch (a full MXU tile of rows)
    sample_size = 256
    model_size = 128
    label_num = 35

    key = jax.random.PRNGKey(0)
    k = jax.random.split(key, 8)

    x = jax.random.normal(k[0], (B, sample_size), dtype=jnp.float32)

    # Weights stored pre-transposed as (in_features, out_features); no biases.
    w1t = jax.random.normal(k[1], (sample_size, model_size), jnp.float32) * 0.05
    w2t = jax.random.normal(k[2], (model_size, model_size), jnp.float32) * 0.05
    w3t = jax.random.normal(k[3], (model_size, label_num), jnp.float32) * 0.05

    # BatchNorm affine params (bn1, bn2); bn3 has affine=False.
    g1 = 1.0 + 0.1 * jax.random.normal(k[4], (1, model_size), jnp.float32)
    b1 = 0.1 * jax.random.normal(k[5], (1, model_size), jnp.float32)
    g2 = 1.0 + 0.1 * jax.random.normal(k[6], (1, model_size), jnp.float32)
    b2 = 0.1 * jax.random.normal(k[7], (1, model_size), jnp.float32)

    out = dnn3_forward(x, w1t, g1, b1, w2t, g2, b2, w3t)
    out = jax.block_until_ready(out)
    assert out.shape == (B, label_num)

    # 1) Tight check against a reference that mirrors the kernel math.
    ref_m = reference_forward_mirror(x, w1t, g1, b1, w2t, g2, b2, w3t)
    assert jnp.allclose(out, ref_m, atol=2e-3, rtol=2e-3), (
        float(jnp.max(jnp.abs(out - ref_m))))

    # 2) Loose sanity check against the full-f32 (PyTorch-semantics) reference.
    ref_f = reference_forward_f32(x, w1t, g1, b1, w2t, g2, b2, w3t)
    assert jnp.allclose(out, ref_f, atol=1.5e-1), (
        float(jnp.max(jnp.abs(out - ref_f))))

    print("KERNEL_OK")
</pallas_src>

<mosaic_0001>
module attributes {stable_mosaic.version = 11 : i64} {
  func.func @dnn3_kernel(%arg0: memref<128x256xf32, #tpu.memory_space<vmem>>, %arg1: memref<256x128xbf16, #tpu.memory_space<vmem>>, %arg2: memref<1x128xf32, #tpu.memory_space<vmem>>, %arg3: memref<1x128xf32, #tpu.memory_space<vmem>>, %arg4: memref<128x128xbf16, #tpu.memory_space<vmem>>, %arg5: memref<1x128xf32, #tpu.memory_space<vmem>>, %arg6: memref<1x128xf32, #tpu.memory_space<vmem>>, %arg7: memref<128x128xbf16, #tpu.memory_space<vmem>>, %arg8: memref<128x128xf32, #tpu.memory_space<vmem>>) attributes {dimension_semantics = [], scalar_prefetch = 0 : i64, scratch_operands = 0 : i64, tpu.core_type = #tpu.core_type<tc>} {
    %c0 = arith.constant 0 : index
    %c0_0 = arith.constant 0 : index
    %0 = vector.load %arg0[%c0, %c0_0] : memref<128x256xf32, #tpu.memory_space<vmem>>, vector<128x256xf32>
    %1 = arith.truncf %0 : vector<128x256xf32> to vector<128x256xbf16>
    %c0_1 = arith.constant 0 : index
    %c0_2 = arith.constant 0 : index
    %2 = vector.load %arg1[%c0_1, %c0_2] : memref<256x128xbf16, #tpu.memory_space<vmem>>, vector<256x128xbf16>
    %cst = arith.constant dense<0.000000e+00> : vector<128x128xf32>
    %3 = tpu.matmul %1, %2, %cst {dimension_numbers = #tpu.dot_dimension_numbers<[1], [0], [0], [1], [0, 0, 1, 1], [], []>} : vector<128x256xbf16>, vector<256x128xbf16>, vector<128x128xf32> -> vector<128x128xf32>
    %c0_3 = arith.constant 0 : index
    %c0_4 = arith.constant 0 : index
    %4 = vector.load %arg2[%c0_3, %c0_4] : memref<1x128xf32, #tpu.memory_space<vmem>>, vector<1x128xf32>
    %c0_5 = arith.constant 0 : index
    %c0_6 = arith.constant 0 : index
    %5 = vector.load %arg3[%c0_5, %c0_6] : memref<1x128xf32, #tpu.memory_space<vmem>>, vector<1x128xf32>
    %cst_7 = arith.constant dense<0.000000e+00> : vector<128xf32>
    %6 = vector.multi_reduction <add>, %3, %cst_7 [0] : vector<128x128xf32> to vector<128xf32>
    %7 = vector.shape_cast %6 : vector<128xf32> to vector<1x128xf32>
    %8 = arith.mulf %3, %3 : vector<128x128xf32>
    %cst_8 = arith.constant dense<0.000000e+00> : vector<128xf32>
    %9 = vector.multi_reduction <add>, %8, %cst_8 [0] : vector<128x128xf32> to vector<128xf32>
    %10 = vector.shape_cast %9 : vector<128xf32> to vector<1x128xf32>
    %cst_9 = arith.constant 7.812500e-03 : f32
    %11 = vector.broadcast %cst_9 : f32 to vector<1x128xf32>
    %12 = arith.mulf %7, %11 : vector<1x128xf32>
    %cst_10 = arith.constant 7.812500e-03 : f32
    %13 = vector.broadcast %cst_10 : f32 to vector<1x128xf32>
    %14 = arith.mulf %10, %13 : vector<1x128xf32>
    %15 = arith.mulf %12, %12 : vector<1x128xf32>
    %16 = arith.subf %14, %15 : vector<1x128xf32>
    %cst_11 = arith.constant 0.000000e+00 : f32
    %17 = vector.broadcast %cst_11 : f32 to vector<1x128xf32>
    %18 = arith.maximumf %16, %17 : vector<1x128xf32>
    %cst_12 = arith.constant 9.99999974E-6 : f32
    %19 = vector.broadcast %cst_12 : f32 to vector<1x128xf32>
    %20 = arith.addf %18, %19 : vector<1x128xf32>
    %21 = math.rsqrt %20 : vector<1x128xf32>
    %22 = arith.mulf %4, %21 : vector<1x128xf32>
    %23 = arith.mulf %12, %22 : vector<1x128xf32>
    %24 = arith.subf %5, %23 : vector<1x128xf32>
    %25 = vector.broadcast %22 : vector<1x128xf32> to vector<128x128xf32>
    %26 = arith.mulf %3, %25 : vector<128x128xf32>
    %27 = vector.broadcast %24 : vector<1x128xf32> to vector<128x128xf32>
    %28 = arith.addf %26, %27 : vector<128x128xf32>
    %cst_13 = arith.constant 0.000000e+00 : f32
    %29 = vector.broadcast %cst_13 : f32 to vector<128x128xf32>
    %30 = arith.maximumf %28, %29 : vector<128x128xf32>
    %31 = arith.truncf %30 : vector<128x128xf32> to vector<128x128xbf16>
    %c0_14 = arith.constant 0 : index
    %c0_15 = arith.constant 0 : index
    %32 = vector.load %arg4[%c0_14, %c0_15] : memref<128x128xbf16, #tpu.memory_space<vmem>>, vector<128x128xbf16>
    %cst_16 = arith.constant dense<0.000000e+00> : vector<128x128xf32>
    %33 = tpu.matmul %31, %32, %cst_16 {dimension_numbers = #tpu.dot_dimension_numbers<[1], [0], [0], [1], [0, 0, 1, 1], [], []>} : vector<128x128xbf16>, vector<128x128xbf16>, vector<128x128xf32> -> vector<128x128xf32>
    %c0_17 = arith.constant 0 : index
    %c0_18 = arith.constant 0 : index
    %34 = vector.load %arg5[%c0_17, %c0_18] : memref<1x128xf32, #tpu.memory_space<vmem>>, vector<1x128xf32>
    %c0_19 = arith.constant 0 : index
    %c0_20 = arith.constant 0 : index
    %35 = vector.load %arg6[%c0_19, %c0_20] : memref<1x128xf32, #tpu.memory_space<vmem>>, vector<1x128xf32>
    %cst_21 = arith.constant dense<0.000000e+00> : vector<128xf32>
    %36 = vector.multi_reduction <add>, %33, %cst_21 [0] : vector<128x128xf32> to vector<128xf32>
    %37 = vector.shape_cast %36 : vector<128xf32> to vector<1x128xf32>
    %38 = arith.mulf %33, %33 : vector<128x128xf32>
    %cst_22 = arith.constant dense<0.000000e+00> : vector<128xf32>
    %39 = vector.multi_reduction <add>, %38, %cst_22 [0] : vector<128x128xf32> to vector<128xf32>
    %40 = vector.shape_cast %39 : vector<128xf32> to vector<1x128xf32>
    %cst_23 = arith.constant 7.812500e-03 : f32
    %41 = vector.broadcast %cst_23 : f32 to vector<1x128xf32>
    %42 = arith.mulf %37, %41 : vector<1x128xf32>
    %cst_24 = arith.constant 7.812500e-03 : f32
    %43 = vector.broadcast %cst_24 : f32 to vector<1x128xf32>
    %44 = arith.mulf %40, %43 : vector<1x128xf32>
    %45 = arith.mulf %42, %42 : vector<1x128xf32>
    %46 = arith.subf %44, %45 : vector<1x128xf32>
    %cst_25 = arith.constant 0.000000e+00 : f32
    %47 = vector.broadcast %cst_25 : f32 to vector<1x128xf32>
    %48 = arith.maximumf %46, %47 : vector<1x128xf32>
    %cst_26 = arith.constant 9.99999974E-6 : f32
    %49 = vector.broadcast %cst_26 : f32 to vector<1x128xf32>
    %50 = arith.addf %48, %49 : vector<1x128xf32>
    %51 = math.rsqrt %50 : vector<1x128xf32>
    %52 = arith.mulf %34, %51 : vector<1x128xf32>
    %53 = arith.mulf %42, %52 : vector<1x128xf32>
    %54 = arith.subf %35, %53 : vector<1x128xf32>
    %55 = vector.broadcast %52 : vector<1x128xf32> to vector<128x128xf32>
    %56 = arith.mulf %33, %55 : vector<128x128xf32>
    %57 = vector.broadcast %54 : vector<1x128xf32> to vector<128x128xf32>
    %58 = arith.addf %56, %57 : vector<128x128xf32>
    %cst_27 = arith.constant 0.000000e+00 : f32
    %59 = vector.broadcast %cst_27 : f32 to vector<128x128xf32>
    %60 = arith.maximumf %58, %59 : vector<128x128xf32>
    %61 = arith.truncf %60 : vector<128x128xf32> to vector<128x128xbf16>
    %c0_28 = arith.constant 0 : index
    %c0_29 = arith.constant 0 : index
    %62 = vector.load %arg7[%c0_28, %c0_29] : memref<128x128xbf16, #tpu.memory_space<vmem>>, vector<128x128xbf16>
    %cst_30 = arith.constant dense<0.000000e+00> : vector<128x128xf32>
    %63 = tpu.matmul %61, %62, %cst_30 {dimension_numbers = #tpu.dot_dimension_numbers<[1], [0], [0], [1], [0, 0, 1, 1], [], []>} : vector<128x128xbf16>, vector<128x128xbf16>, vector<128x128xf32> -> vector<128x128xf32>
    %cst_31 = arith.constant dense<0.000000e+00> : vector<128xf32>
    %64 = vector.multi_reduction <add>, %63, %cst_31 [0] : vector<128x128xf32> to vector<128xf32>
    %65 = vector.shape_cast %64 : vector<128xf32> to vector<1x128xf32>
    %66 = arith.mulf %63, %63 : vector<128x128xf32>
    %cst_32 = arith.constant dense<0.000000e+00> : vector<128xf32>
    %67 = vector.multi_reduction <add>, %66, %cst_32 [0] : vector<128x128xf32> to vector<128xf32>
    %68 = vector.shape_cast %67 : vector<128xf32> to vector<1x128xf32>
    %cst_33 = arith.constant 7.812500e-03 : f32
    %69 = vector.broadcast %cst_33 : f32 to vector<1x128xf32>
    %70 = arith.mulf %65, %69 : vector<1x128xf32>
    %cst_34 = arith.constant 7.812500e-03 : f32
    %71 = vector.broadcast %cst_34 : f32 to vector<1x128xf32>
    %72 = arith.mulf %68, %71 : vector<1x128xf32>
    %73 = arith.mulf %70, %70 : vector<1x128xf32>
    %74 = arith.subf %72, %73 : vector<1x128xf32>
    %cst_35 = arith.constant 0.000000e+00 : f32
    %75 = vector.broadcast %cst_35 : f32 to vector<1x128xf32>
    %76 = arith.maximumf %74, %75 : vector<1x128xf32>
    %cst_36 = arith.constant 9.99999974E-6 : f32
    %77 = vector.broadcast %cst_36 : f32 to vector<1x128xf32>
    %78 = arith.addf %76, %77 : vector<1x128xf32>
    %79 = math.rsqrt %78 : vector<1x128xf32>
    %80 = arith.mulf %70, %79 : vector<1x128xf32>
    %cst_37 = arith.constant 0.000000e+00 : f32
    %81 = vector.broadcast %cst_37 : f32 to vector<1x128xf32>
    %82 = arith.subf %81, %80 : vector<1x128xf32>
    %83 = vector.broadcast %79 : vector<1x128xf32> to vector<128x128xf32>
    %84 = arith.mulf %63, %83 : vector<128x128xf32>
    %85 = vector.broadcast %82 : vector<1x128xf32> to vector<128x128xf32>
    %86 = arith.addf %84, %85 : vector<128x128xf32>
    %87 = tpu.iota {dimensions = array<i32: 1>} : vector<128x128xi32>
    %c35_i32 = arith.constant 35 : i32
    %88 = vector.broadcast %c35_i32 : i32 to vector<128x128xi32>
    %89 = arith.cmpi slt, %87, %88 : vector<128x128xi32>
    %cst_38 = arith.constant -1.000000e+30 : f32
    %90 = vector.broadcast %cst_38 : f32 to vector<128x128xf32>
    %91 = arith.select %89, %86, %90 : vector<128x128xi1>, vector<128x128xf32>
    %cst_39 = arith.constant dense<0xFF800000> : vector<128xf32>
    %92 = vector.multi_reduction <maximumf>, %91, %cst_39 [1] : vector<128x128xf32> to vector<128xf32>
    %93 = vector.shape_cast %92 : vector<128xf32> to vector<128x1xf32>
    %94 = vector.broadcast %93 : vector<128x1xf32> to vector<128x128xf32>
    %95 = arith.subf %91, %94 : vector<128x128xf32>
    %96 = math.exp %95 : vector<128x128xf32>
    %cst_40 = arith.constant dense<0.000000e+00> : vector<128xf32>
    %97 = vector.multi_reduction <add>, %96, %cst_40 [1] : vector<128x128xf32> to vector<128xf32>
    %98 = vector.shape_cast %97 : vector<128xf32> to vector<128x1xf32>
    %99 = math.log %98 : vector<128x1xf32>
    %100 = vector.broadcast %99 : vector<128x1xf32> to vector<128x128xf32>
    %101 = arith.subf %95, %100 : vector<128x128xf32>
    %c0_41 = arith.constant 0 : index
    %c0_42 = arith.constant 0 : index
    %102 = vector.load %arg8[%c0_41, %c0_42] : memref<128x128xf32, #tpu.memory_space<vmem>>, vector<128x128xf32>
    tpu.vector_store %arg8[%c0_41, %c0_42], %101 {strides = array<i32>} : memref<128x128xf32, #tpu.memory_space<vmem>>, vector<128x128xf32>,
    return
  }
}

</mosaic_0001>

<bundles_post_ra>
// kernel: tpu_custom_call.1
= control target key start
LH: loop header
LB: loop body
LE: loop exit
PB: predicated region body
PF: predicated region fallthrough
CT: control target
= control target key end

     0   :  { %13 = vsyncpa [#allocation3], 0  ;;  %s2400_s0 = inlined_call_operand.hbm [shape: f32[128,256], index: 0, kind: input, shape index: {}]   ;;  %s2401_s1 = inlined_call_operand.hbm [shape: bf16[256,128], index: 1, kind: input, shape index: {}]   ;;  %s2402_s2 = inlined_call_operand.hbm [shape: f32[1,128], index: 2, kind: input, shape index: {}]   ;;  %s2403_s3 = inlined_call_operand.hbm [shape: f32[1,128], index: 3, kind: input, shape index: {}]   ;;  %s2404_s4 = inlined_call_operand.hbm [shape: bf16[128,128], index: 4, kind: input, shape index: {}]   ;;  %s2405_s5 = inlined_call_operand.hbm [shape: f32[1,128], index: 5, kind: input, shape index: {}]   ;;  %s2406_s6 = inlined_call_operand.hbm [shape: f32[1,128], index: 6, kind: input, shape index: {}]   ;;  %s2407_s7 = inlined_call_operand.hbm [shape: bf16[128,128], index: 7, kind: input, shape index: {}]   ;;  %s2408_s8 = inlined_call_operand.hbm [shape: f32[128,128], index: 8, kind: output, shape index: {}]  }
   0x1   :  { %14 = vsyncpa [#allocation6], 0 }
   0x2   :  { %15 = vsyncpa [#allocation9], 0 }
   0x3   :  { %16 = vsyncpa [#allocation12], 0 }
   0x4   :  { %17 = vsyncpa [#allocation15], 0 }
   0x5   :  { %18 = vsyncpa [#allocation4], 0  ;;  %s1837_s27 = smov [#allocation5]   ;;  %s1627_s9 = scalar_lea.hbm %s2401_s1, 2048 }
   0x6   :  { %s36_s28 = sshll.u32 %s1837_s27, 4  ;;  %p1628_p0 = scmp.ne.s32.totalorder %s2401_s1, %s1627_s9  ;;  %s37_s28 = int_to_ptr.vmem [resolvable:$true] %s36_s28 }
   0x7   :  { %p1631_p1 = scmp.lt.u32.totalorder %s1627_s9, %s2401_s1 }
   0x9   :  { %p1633_p2 = pnand %p1631_p1, %p1628_p0 }
   0xb   :  { %1636 = shalt.err (!%p1633_p2)
}
   0xc   :  { %s1637_s14 = scalar_lea.vmem %s37_s28, 2048  ;;  %p1642_p4 = scmp.lt.s32.totalorder %s37_s28, %s37_s28 }
   0xd   :  { %p1638_p3 = scmp.ne.s32.totalorder %s37_s28, %s1637_s14  ;;  %p1643_p5 = scmp.lt.s32.totalorder %s1637_s14, %s1637_s14 }
   0xf   :  { %p1644_p6 = por %p1643_p5, %p1642_p4 }
  0x11   :  { %p1645_p7 = pnand %p1644_p6, %p1638_p3 }
  0x13   :  { %1648 = shalt.err (!%p1645_p7)
}
  0x14   :  { %s1838_s15 = smov 64   ;;  %s1839_s16 = smov 4  }
  0x15   :  { %42 = dma.hbm_to_vmem [thread:$0]  %s2401_s1, 2048, %s37_s28, [#allocation6], %s1838_s15, %s1838_s15, %s1839_s16  }
  0x16   :  { %s1840_s19 = smov [#allocation8]   ;;  %s1841_s21 = smov [#allocation11]  }
  0x17   :  { %s59_s20 = sshll.u32 %s1840_s19, 4  ;;  %s81_s22 = sshll.u32 %s1841_s21, 4  ;;  %s60_s20 = int_to_ptr.vmem [resolvable:$true] %s59_s20  ;;  %s82_s22 = int_to_ptr.vmem [resolvable:$true] %s81_s22 }
  0x18   :  { %s1649_s25 = scalar_lea.hbm %s2403_s3, 16 }
  0x19   :  { %p1650_p8 = scmp.ne.s32.totalorder %s2403_s3, %s1649_s25  ;;  %p1653_p9 = scmp.lt.u32.totalorder %s1649_s25, %s2403_s3 }
  0x1b   :  { %p1655_p10 = pnand %p1653_p9, %p1650_p8 }
  0x1d   :  { %1658 = shalt.err (!%p1655_p10)
}
  0x1e   :  { %s1659_s1 = scalar_lea.vmem %s60_s20, 16  ;;  %s1663_s28 = scalar_lea.vmem %s60_s20, 32 }
  0x1f   :  { %p1660_p11 = scmp.ne.s32.totalorder %s60_s20, %s1659_s1  ;;  %p1664_p12 = scmp.lt.s32.totalorder %s60_s20, %s60_s20 }
  0x20   :  { %p1665_p13 = scmp.lt.s32.totalorder %s1663_s28, %s1659_s1 }
  0x22   :  { %p1666_p0 = por %p1665_p13, %p1664_p12 }
  0x24   :  { %p1667_p1 = pnand %p1666_p0, %p1660_p11 }
  0x26   :  { %1670 = shalt.err (!%p1667_p1)
}
  0x27   :  { %62 = dma.hbm_to_vmem [thread:$0]  %s2403_s3, 16, %s60_s20, [#allocation9]  }
  0x28   :  { %s1671_s13 = scalar_lea.hbm %s2405_s5, 16 }
  0x29   :  { %p1672_p2 = scmp.ne.s32.totalorder %s2405_s5, %s1671_s13  ;;  %p1675_p3 = scmp.lt.u32.totalorder %s1671_s13, %s2405_s5 }
  0x2b   :  { %p1677_p4 = pnand %p1675_p3, %p1672_p2 }
  0x2d   :  { %1680 = shalt.err (!%p1677_p4)
}
  0x2e   :  { %s1681_s21 = scalar_lea.vmem %s82_s22, 16  ;;  %s1685_s23 = scalar_lea.vmem %s82_s22, 32 }
  0x2f   :  { %p1682_p5 = scmp.ne.s32.totalorder %s82_s22, %s1681_s21  ;;  %p1686_p6 = scmp.lt.s32.totalorder %s82_s22, %s82_s22 }
  0x30   :  { %p1687_p7 = scmp.lt.s32.totalorder %s1685_s23, %s1681_s21 }
  0x32   :  { %p1688_p8 = por %p1687_p7, %p1686_p6 }
  0x34   :  { %p1689_p9 = pnand %p1688_p8, %p1682_p5 }
  0x36   :  { %1692 = shalt.err (!%p1689_p9)
}
  0x37   :  { %84 = dma.hbm_to_vmem [thread:$0]  %s2405_s5, 16, %s82_s22, [#allocation12]  }
  0x38   :  { %s1842_s24 = smov [#allocation2]   ;;  %s1693_s29 = scalar_lea.hbm %s2400_s0, 4096 }
  0x39   :  { %s24_s25 = sshll.u32 %s1842_s24, 4  ;;  %p1694_p10 = scmp.ne.s32.totalorder %s2400_s0, %s1693_s29  ;;  %s25_s25 = int_to_ptr.vmem [resolvable:$true] %s24_s25 }
  0x3a   :  { %p1697_p11 = scmp.lt.u32.totalorder %s1693_s29, %s2400_s0 }
  0x3c   :  { %p1699_p12 = pnand %p1697_p11, %p1694_p10 }
  0x3e   :  { %1702 = shalt.err (!%p1699_p12)
}
  0x3f   :  { %s1703_s10 = scalar_lea.vmem %s25_s25, 4096  ;;  %p1708_p0 = scmp.lt.s32.totalorder %s25_s25, %s25_s25 }
  0x40   :  { %p1704_p13 = scmp.ne.s32.totalorder %s25_s25, %s1703_s10  ;;  %p1709_p1 = scmp.lt.s32.totalorder %s1703_s10, %s1703_s10 }
  0x42   :  { %p1710_p2 = por %p1709_p1, %p1708_p0 }
  0x44   :  { %p1711_p3 = pnand %p1710_p2, %p1704_p13 }
  0x46   :  { %1714 = shalt.err (!%p1711_p3)
}
  0x47   :  { %s1843_s5 = smov 256   ;;  %s1844_s22 = smov 16  }
  0x48   :  { %30 = dma.hbm_to_vmem [thread:$0]  %s2400_s0, 4096, %s25_s25, [#allocation3], %s1843_s5, %s1843_s5, %s1844_s22  }
  0x49   :  { %s1845_s13 = smov [#allocation7]   ;;  %s1846_s17 = smov [#allocation10]  }
  0x4a   :  { %s49_s14 = sshll.u32 %s1845_s13, 4  ;;  %s68_s18 = sshll.u32 %s1846_s17, 4  ;;  %s50_s14 = int_to_ptr.vmem [resolvable:$true] %s49_s14  ;;  %s1948_s18 = int_to_ptr.vmem [resolvable:$true] %s68_s18 }
  0x4b   :  { %s1715_s23 = scalar_lea.hbm %s2402_s2, 16 }
  0x4c   :  { %p1716_p4 = scmp.ne.s32.totalorder %s2402_s2, %s1715_s23  ;;  %p1719_p5 = scmp.lt.u32.totalorder %s1715_s23, %s2402_s2 }
  0x4e   :  { %p1721_p6 = pnand %p1719_p5, %p1716_p4 }
  0x50   :  { %1724 = shalt.err (!%p1721_p6)
}
  0x51   :  { %s1725_s0 = scalar_lea.vmem %s50_s14, 16  ;;  %s1729_s25 = scalar_lea.vmem %s50_s14, 32 }
  0x52   :  { %p1726_p7 = scmp.ne.s32.totalorder %s50_s14, %s1725_s0  ;;  %p1730_p8 = scmp.lt.s32.totalorder %s50_s14, %s50_s14 }
  0x53   :  { %p1731_p9 = scmp.lt.s32.totalorder %s1729_s25, %s1725_s0 }
  0x55   :  { %p1732_p10 = por %p1731_p9, %p1730_p8 }
  0x57   :  { %p1733_p11 = pnand %p1732_p10, %p1726_p7 }
  0x59   :  { %1736 = shalt.err (!%p1733_p11)
}
  0x5a   :  { %52 = dma.hbm_to_vmem [thread:$0]  %s2402_s2, 16, %s50_s14, [#allocation6]  }
  0x5b   :  { %s1737_s28 = scalar_lea.hbm %s2404_s4, 1024 }
  0x5c   :  { %p1738_p12 = scmp.ne.s32.totalorder %s2404_s4, %s1737_s28  ;;  %p1741_p13 = scmp.lt.u32.totalorder %s1737_s28, %s2404_s4 }
  0x5e   :  { %p1743_p0 = pnand %p1741_p13, %p1738_p12 }
  0x60   :  { %1746 = shalt.err (!%p1743_p0)
}
  0x61   :  { %s1747_s11 = scalar_lea.vmem %s1948_s18, 1024  ;;  %p1752_p2 = scmp.lt.s32.totalorder %s1948_s18, %s1948_s18 }
  0x62   :  { %p1748_p1 = scmp.ne.s32.totalorder %s1948_s18, %s1747_s11  ;;  %p1753_p3 = scmp.lt.s32.totalorder %s1747_s11, %s1747_s11 }
  0x64   :  { %p1754_p4 = por %p1753_p3, %p1752_p2 }
  0x66   :  { %p1755_p5 = pnand %p1754_p4, %p1748_p1 }
  0x68   :  { %1758 = shalt.err (!%p1755_p5)
}
  0x69   :  { %74 = dma.hbm_to_vmem [thread:$0]  %s2404_s4, 1024, %s1948_s18, [#allocation9], %s1838_s15, %s1838_s15, %s1839_s16  }
  0x6a   :  { %s1847_s13 = smov [#allocation13]   ;;  %s1848_s17 = smov [#allocation14]  }
  0x6b   :  { %s91_s14 = sshll.u32 %s1847_s13, 4  ;;  %s100_s19 = sshll.u32 %s1848_s17, 4  ;;  %s92_s14 = int_to_ptr.vmem [resolvable:$true] %s91_s14  ;;  %s1982_s19 = int_to_ptr.vmem [resolvable:$true] %s100_s19 }
  0x6c   :  { %s1759_s3 = scalar_lea.hbm %s2406_s6, 16 }
  0x6d   :  { %p1760_p6 = scmp.ne.s32.totalorder %s2406_s6, %s1759_s3  ;;  %p1763_p7 = scmp.lt.u32.totalorder %s1759_s3, %s2406_s6 }
  0x6f   :  { %p1765_p8 = pnand %p1763_p7, %p1760_p6 }
  0x71   :  { %1768 = shalt.err (!%p1765_p8)
}
  0x72   :  { %s1769_s4 = scalar_lea.vmem %s92_s14, 16  ;;  %s1773_s18 = scalar_lea.vmem %s92_s14, 32 }
  0x73   :  { %p1770_p9 = scmp.ne.s32.totalorder %s92_s14, %s1769_s4  ;;  %p1774_p10 = scmp.lt.s32.totalorder %s92_s14, %s92_s14 }
  0x74   :  { %p1775_p11 = scmp.lt.s32.totalorder %s1773_s18, %s1769_s4 }
  0x76   :  { %p1776_p12 = por %p1775_p11, %p1774_p10 }
  0x78   :  { %p1777_p13 = pnand %p1776_p12, %p1770_p9 }
  0x7a   :  { %1780 = shalt.err (!%p1777_p13)
}
  0x7b   :  { %94 = dma.hbm_to_vmem [thread:$0]  %s2406_s6, 16, %s92_s14, [#allocation12]  }
  0x7c   :  { %s1781_s1 = scalar_lea.hbm %s2407_s7, 1024 }
  0x7d   :  { %p1782_p0 = scmp.ne.s32.totalorder %s2407_s7, %s1781_s1  ;;  %p1785_p1 = scmp.lt.u32.totalorder %s1781_s1, %s2407_s7 }
  0x7f   :  { %p1787_p2 = pnand %p1785_p1, %p1782_p0 }
  0x81   :  { %1790 = shalt.err (!%p1787_p2)
}
  0x82   :  { %s1791_s22 = scalar_lea.vmem %s1982_s19, 1024  ;;  %p1796_p4 = scmp.lt.s32.totalorder %s1982_s19, %s1982_s19 }
  0x83   :  { %p1792_p3 = scmp.ne.s32.totalorder %s1982_s19, %s1791_s22  ;;  %p1797_p5 = scmp.lt.s32.totalorder %s1791_s22, %s1791_s22 }
  0x85   :  { %p1798_p6 = por %p1797_p5, %p1796_p4 }
  0x87   :  { %p1799_p7 = pnand %p1798_p6, %p1792_p3 }
  0x89   :  { %1802 = shalt.err (!%p1799_p7)
}
  0x8a   :  { %106 = dma.hbm_to_vmem [thread:$0]  %s2407_s7, 1024, %s1982_s19, [#allocation15], %s1838_s15, %s1838_s15, %s1839_s16  }
  0x8b   :  { %1825 = dma.done.wait [#allocation3], 4096  }
  0x8c   :  { %1826 = vsyncadd [#allocation3], 4294963200 }
  0x8d   :  { %1827 = dma.done.wait [#allocation6], 2064  }
  0x8e   :  { %1828 = vsyncadd [#allocation6], 4294965232 }
  0x8f   :  { %1829 = dma.done.wait [#allocation9], 1040  }
  0x90   :  { %1830 = vsyncadd [#allocation9], 4294966256 }
  0x91   :  { %1831 = dma.done.wait [#allocation12], 32  }
  0x92   :  { %1832 = vsyncadd [#allocation12], 4294967264 }
  0x93   :  { %1833 = dma.done.wait [#allocation15], 1024  }
  0x94   :  { %1834 = vsyncadd [#allocation15], 4294966272  ;;  %v1525_v0 = vld [vmem:[#allocation5 + $0x40] sm:$0xff]   ;;  %v1527_v2 = vld [vmem:[#allocation5 + $0x48] sm:$0xff]   ;;  %s1849_s7 = smov [#allocation16]  }
  0x95   :  { %v1526_v1 = vld [vmem:[#allocation5] sm:$0xff]   ;;  %1350 = vmatprep.subr.bf16.mxu0 %v1525_v0  ;;  %v1528_v3 = vld [vmem:[#allocation5 + $0x8] sm:$0xff]   ;;  %v1529_v4 = vld [vmem:[#allocation5 + $0x50] sm:$0xff]   ;;  %s1302_s15 = sshll.u32 %s1849_s7, 4  ;;  %s1303_s15 = int_to_ptr.vmem [resolvable:$true] %s1302_s15 }
  0x96   :  { %1351 = vmatpush3.bf16.msra.mxu0 %v1526_v1  ;;  %v1530_v5 = vld [vmem:[#allocation5 + $0x10] sm:$0xff]   ;;  %v1531_v6 = vld [vmem:[#allocation5 + $0x58] sm:$0xff]   ;;  %v1533_v8 = vld [vmem:[#allocation5 + $0x60] sm:$0xff]   ;;  %s1803_s16 = scalar_lea.vmem %s1303_s15, 2048  ;;  %p1808_p9 = scmp.lt.s32.totalorder %s1303_s15, %s1303_s15 }
  0x97   :  { %1352 = vmatprep.subr.bf16.mxu0 %v1527_v2  ;;  %v1532_v7 = vld [vmem:[#allocation5 + $0x18] sm:$0xff]   ;;  %v1534_v9 = vld [vmem:[#allocation5 + $0x20] sm:$0xff]   ;;  %v1535_v10 = vld [vmem:[#allocation5 + $0x68] sm:$0xff]   ;;  %p1804_p8 = scmp.ne.s32.totalorder %s1303_s15, %s1803_s16  ;;  %p1809_p10 = scmp.lt.s32.totalorder %s1803_s16, %s1803_s16 }
  0x98   :  { %v133_v11 = vld [vmem:[#allocation2 + $0x8] sm:$0xff]  ;;  %v135_v12 = vld [vmem:[#allocation2 + $0x18] sm:$0xff]  ;;  %v1537_v15 = vld [vmem:[#allocation5 + $0x70] sm:$0xff]  }
  0x99   :  { %v165_v13 = vpack.c.bf16 %v135_v12, %v133_v11  ;;  %v1536_v14 = vld [vmem:[#allocation5 + $0x28] sm:$0xff]   ;;  %v1538_v16 = vld [vmem:[#allocation5 + $0x30] sm:$0xff]   ;;  %v1539_v17 = vld [vmem:[#allocation5 + $0x78] sm:$0xff]   ;;  %p1810_p11 = por %p1809_p10, %p1808_p9 }
  0x9a   :  { %1353 = vmatpush3.bf16.msra.mxu0 %v1528_v3  ;;  %v1540_v18 = vld [vmem:[#allocation5 + $0x38] sm:$0xff]   ;;  %v132_v19 = vld [vmem:[#allocation2] sm:$0xff]  ;;  %v134_v20 = vld [vmem:[#allocation2 + $0x10] sm:$0xff] }
  0x9b   :  { %1354 = vmatprep.subr.bf16.mxu0 %v1529_v4  ;;  %340 = vmatprep.mubr.bf16.mxu0 %v165_v13  ;;  %v137_v21 = vld [vmem:[#allocation2 + $0x28] sm:$0xff]  ;;  %v139_v22 = vld [vmem:[#allocation2 + $0x38] sm:$0xff]  ;;  %v164_v23 = vpack.c.bf16 %v134_v20, %v132_v19  ;;  %v136_v25 = vld [vmem:[#allocation2 + $0x20] sm:$0xff]  ;;  %p1811_p12 = pnand %p1810_p11, %p1804_p8 }
  0x9c   :  { %v167_v24 = vpack.c.bf16 %v139_v22, %v137_v21  ;;  %v138_v26 = vld [vmem:[#allocation2 + $0x30] sm:$0xff]  ;;  %v141_v27 = vld [vmem:[#allocation2 + $0x48] sm:$0xff]  ;;  %v143_v28 = vld [vmem:[#allocation2 + $0x58] sm:$0xff] }
  0x9d   :  { %v166_v29 = vpack.c.bf16 %v138_v26, %v136_v25  ;;  %v169_v30 = vpack.c.bf16 %v143_v28, %v141_v27  ;;  %v140_v31 = vld [vmem:[#allocation2 + $0x40] sm:$0xff]  ;;  %v142_v32 = vld [vmem:[#allocation2 + $0x50] sm:$0xff]  ;;  %v145_v33 = vld [vmem:[#allocation2 + $0x68] sm:$0xff] }
  0x9e   :  { %1355 = vmatpush3.bf16.msra.mxu0 %v1530_v5  ;;  %v147_v34 = vld [vmem:[#allocation2 + $0x78] sm:$0xff]  ;;  %v168_v35 = vpack.c.bf16 %v142_v32, %v140_v31  ;;  %v144_v37 = vld [vmem:[#allocation2 + $0x60] sm:$0xff]  ;;  %v146_v38 = vld [vmem:[#allocation2 + $0x70] sm:$0xff] }
  0x9f   :  { %1356 = vmatprep.subr.bf16.mxu0 %v1531_v6  ;;  %v171_v36 = vpack.c.bf16 %v147_v34, %v145_v33  ;;  %v149_v39 = vld [vmem:[#allocation2 + $0x88] sm:$0xff]  ;;  %v151_v40 = vld [vmem:[#allocation2 + $0x98] sm:$0xff]  ;;  %v170_v41 = vpack.c.bf16 %v146_v38, %v144_v37  ;;  %v148_v43 = vld [vmem:[#allocation2 + $0x80] sm:$0xff] }
  0xa0   :  { %v173_v42 = vpack.c.bf16 %v151_v40, %v149_v39  ;;  %v150_v44 = vld [vmem:[#allocation2 + $0x90] sm:$0xff]  ;;  %v153_v45 = vld [vmem:[#allocation2 + $0xa8] sm:$0xff]  ;;  %v155_v46 = vld [vmem:[#allocation2 + $0xb8] sm:$0xff] }
  0xa1   :  { %v172_v47 = vpack.c.bf16 %v150_v44, %v148_v43  ;;  %v175_v48 = vpack.c.bf16 %v155_v46, %v153_v45  ;;  %v152_v49 = vld [vmem:[#allocation2 + $0xa0] sm:$0xff]  ;;  %v154_v50 = vld [vmem:[#allocation2 + $0xb0] sm:$0xff]  ;;  %v157_v51 = vld [vmem:[#allocation2 + $0xc8] sm:$0xff] }
  0xa2   :  { %1357 = vmatpush3.bf16.msra.mxu0 %v1532_v7  ;;  %v159_v52 = vld [vmem:[#allocation2 + $0xd8] sm:$0xff]  ;;  %v174_v53 = vpack.c.bf16 %v154_v50, %v152_v49  ;;  %v156_v55 = vld [vmem:[#allocation2 + $0xc0] sm:$0xff]  ;;  %v158_v56 = vld [vmem:[#allocation2 + $0xd0] sm:$0xff] }
  0xa3   :  { %1358 = vmatprep.subr.bf16.mxu0 %v1533_v8  ;;  %v177_v54 = vpack.c.bf16 %v159_v52, %v157_v51  ;;  %v161_v57 = vld [vmem:[#allocation2 + $0xe8] sm:$0xff]  ;;  %v163_v58 = vld [vmem:[#allocation2 + $0xf8] sm:$0xff]  ;;  %v176_v59 = vpack.c.bf16 %v158_v56, %v156_v55  ;;  %v160_v61 = vld [vmem:[#allocation2 + $0xe0] sm:$0xff] }
  0xa4   :  { %v179_v60 = vpack.c.bf16 %v163_v58, %v161_v57  ;;  %v162_v62 = vld [vmem:[#allocation2 + $0xf0] sm:$0xff]  ;;  %v1541_v0 = vld [vmem:[#allocation10] sm:$0xff]   ;;  %v1544_v3 = vld [vmem:[#allocation10 + $0x18] sm:$0xff]  }
  0xa5   :  { %v178_v63 = vpack.c.bf16 %v162_v62, %v160_v61  ;;  %1446 = vmatprep.subr.bf16.mxu1 %v1541_v0  ;;  %v1542_v1 = vld [vmem:[#allocation10 + $0x8] sm:$0xff]   ;;  %v1543_v2 = vld [vmem:[#allocation10 + $0x10] sm:$0xff]   ;;  %v1545_v4 = vld [vmem:[#allocation10 + $0x20] sm:$0xff]  }
  0xa6   :  { %1359 = vmatpush3.bf16.msra.mxu0 %v1534_v9  ;;  %1447 = vmatpush3.bf16.msra.mxu1 %v1541_v0  ;;  %v1546_v5 = vld [vmem:[#allocation10 + $0x28] sm:$0xff]   ;;  %v1547_v6 = vld [vmem:[#allocation10 + $0x30] sm:$0xff]   ;;  %v1548_v7 = vld [vmem:[#allocation10 + $0x38] sm:$0xff]  }
  0xa7   :  { %1360 = vmatprep.subr.bf16.mxu0 %v1535_v10  ;;  %1448 = vmatprep.subr.bf16.mxu1 %v1542_v1 }
  0xaa   :  { %1361 = vmatpush3.bf16.msra.mxu0 %v1536_v14  ;;  %1449 = vmatpush3.bf16.msra.mxu1 %v1542_v1 }
  0xab   :  { %1362 = vmatprep.subr.bf16.mxu0 %v1537_v15  ;;  %1450 = vmatprep.subr.bf16.mxu1 %v1543_v2 }
  0xae   :  { %1363 = vmatpush3.bf16.msra.mxu0 %v1538_v16  ;;  %1451 = vmatpush3.bf16.msra.mxu1 %v1543_v2 }
  0xaf   :  { %1364 = vmatprep.subr.bf16.mxu0 %v1539_v17  ;;  %1452 = vmatprep.subr.bf16.mxu1 %v1544_v3 }
  0xb2   :  { %1365 = vmatpush3.bf16.msra.mxu0 %v1540_v18  ;;  %1453 = vmatpush3.bf16.msra.mxu1 %v1544_v3 }
  0xb3   :  { %1454 = vmatprep.subr.bf16.mxu1 %v1545_v4 }
  0xb5   :  { %341 = vmatmul.mubr.bf16.vlgmr.msra.gmra.mrb[0].mxu0 %v164_v23 }
  0xb6   :  { %348 = vmatprep.mubr.bf16.mxu0 %v167_v24  ;;  %1455 = vmatpush3.bf16.msra.mxu1 %v1545_v4 }
  0xb7   :  { %1456 = vmatprep.subr.bf16.mxu1 %v1546_v5 }
  0xba   :  { %1457 = vmatpush3.bf16.msra.mxu1 %v1546_v5 }
  0xbb   :  { %1458 = vmatprep.subr.bf16.mxu1 %v1547_v6 }
  0xbd   :  { %349 = vmatmul.mubr.bf16.gmra.mrb[4].mxu0 %v166_v29 }
  0xbe   :  { %356 = vmatprep.mubr.bf16.mxu0 %v169_v30  ;;  %1459 = vmatpush3.bf16.msra.mxu1 %v1547_v6 }
  0xbf   :  { %1460 = vmatprep.subr.bf16.mxu1 %v1548_v7 }
  0xc2   :  { %1461 = vmatpush3.bf16.msra.mxu1 %v1548_v7 }
  0xc5   :  { %357 = vmatmul.mubr.bf16.gmra.mrb[8].mxu0 %v168_v35 }
  0xc6   :  { %364 = vmatprep.mubr.bf16.mxu0 %v171_v36 }
  0xcd   :  { %365 = vmatmul.mubr.bf16.gmra.mrb[12].mxu0 %v170_v41 }
  0xce   :  { %372 = vmatprep.mubr.bf16.mxu0 %v173_v42 }
  0xd5   :  { %373 = vmatmul.mubr.bf16.gmra.mrb[16].mxu0 %v172_v47 }
  0xd6   :  { %380 = vmatprep.mubr.bf16.mxu0 %v175_v48 }
  0xdd   :  { %381 = vmatmul.mubr.bf16.gmra.mrb[20].mxu0 %v174_v53 }
  0xde   :  { %388 = vmatprep.mubr.bf16.mxu0 %v177_v54 }
  0xe5   :  { %389 = vmatmul.mubr.bf16.gmra.mrb[24].mxu0 %v176_v59 }
  0xe6   :  { %396 = vmatprep.mubr.bf16.mxu0 %v179_v60 }
  0xed   :  { %397 = vmatmul.mubr.bf16.gmra.mrb[28].mxu0 %v178_v63 }
 0x188   :  { %v1366_v8 = vpop.f32.mrb[0].mxu0 }
 0x189   :  { %v1367_v9 = vpop.f32.mrb[1].mxu0 }
 0x18a   :  { %v2016_v10 = vadd.f32 %v1367_v9, %v1366_v8  ;;  %v1369_v11 = vpop.f32.mrb[2].mxu0 }
 0x18b   :  { %v1370_v12 = vpop.f32.mrb[3].mxu0 }
 0x18c   :  { %v2018_v13 = vadd.f32 %v1370_v12, %v1369_v11  ;;  %v428_v21 = vmul.f32 %v2016_v10, %v2016_v10 }
 0x18e   :  { %v429_v20 = vmul.f32 %v2018_v13, %v2018_v13  ;;  %v407_v22 = vadd.f32 %v2018_v13, %v2016_v10 }
 0x190   :  { %v1372_v14 = vpop.f32.mrb[4].mxu0  ;;  %v444_v26 = vadd.f32 %v429_v20, %v428_v21 }
 0x191   :  { %v1373_v15 = vpop.f32.mrb[5].mxu0 }
 0x192   :  { %v2020_v16 = vadd.f32 %v1373_v15, %v1372_v14  ;;  %v1375_v17 = vpop.f32.mrb[6].mxu0 }
 0x193   :  { %v1376_v18 = vpop.f32.mrb[7].mxu0 }
 0x194   :  { %v2022_v19 = vadd.f32 %v1376_v18, %v1375_v17  ;;  %v430_v23 = vmul.f32 %v2020_v16, %v2020_v16  ;;  %v408_v27 = vadd.f32 %v2020_v16, %v407_v22 }
 0x196   :  { %v445_v31 = vadd.f32 %v444_v26, %v430_v23  ;;  %v431_v32 = vmul.f32 %v2022_v19, %v2022_v19  ;;  %v409_v34 = vadd.f32 %v2022_v19, %v408_v27 }
 0x198   :  { %v1378_v24 = vpop.f32.mrb[8].mxu0  ;;  %v446_v36 = vadd.f32 %v445_v31, %v431_v32 }
 0x199   :  { %v1379_v25 = vpop.f32.mrb[9].mxu0 }
 0x19a   :  { %v2033_v28 = vadd.f32 %v1379_v25, %v1378_v24  ;;  %v1381_v29 = vpop.f32.mrb[10].mxu0 }
 0x19b   :  { %v1382_v30 = vpop.f32.mrb[11].mxu0 }
 0x19c   :  { %v2037_v33 = vadd.f32 %v1382_v30, %v1381_v29  ;;  %v432_v35 = vmul.f32 %v2033_v28, %v2033_v28  ;;  %v410_v37 = vadd.f32 %v2033_v28, %v409_v34 }
 0x19e   :  { %v447_v40 = vadd.f32 %v446_v36, %v432_v35  ;;  %v433_v41 = vmul.f32 %v2037_v33, %v2037_v33  ;;  %v411_v45 = vadd.f32 %v2037_v33, %v410_v37 }
 0x1a0   :  { %v1384_v38 = vpop.f32.mrb[12].mxu0  ;;  %v448_v48 = vadd.f32 %v447_v40, %v433_v41 }
 0x1a1   :  { %v1385_v39 = vpop.f32.mrb[13].mxu0 }
 0x1a2   :  { %v2045_v42 = vadd.f32 %v1385_v39, %v1384_v38  ;;  %v1387_v43 = vpop.f32.mrb[14].mxu0 }
 0x1a3   :  { %v1388_v44 = vpop.f32.mrb[15].mxu0 }
 0x1a4   :  { %v434_v46 = vmul.f32 %v2045_v42, %v2045_v42  ;;  %v2050_v47 = vadd.f32 %v1388_v44, %v1387_v43  ;;  %v412_v49 = vadd.f32 %v2045_v42, %v411_v45 }
 0x1a6   :  { %v449_v50 = vadd.f32 %v448_v48, %v434_v46  ;;  %v435_v51 = vmul.f32 %v2050_v47, %v2050_v47  ;;  %v413_v54 = vadd.f32 %v2050_v47, %v412_v49 }
 0x1a8   :  { %v1390_v52 = vpop.f32.mrb[16].mxu0  ;;  %v450_v58 = vadd.f32 %v449_v50, %v435_v51 }
 0x1a9   :  { %v1391_v53 = vpop.f32.mrb[17].mxu0 }
 0x1aa   :  { %v2056_v55 = vadd.f32 %v1391_v53, %v1390_v52  ;;  %v1393_v56 = vpop.f32.mrb[18].mxu0 }
 0x1ab   :  { %v1394_v57 = vpop.f32.mrb[19].mxu0 }
 0x1ac   :  { %v414_v59 = vadd.f32 %v2056_v55, %v413_v54  ;;  %v436_v60 = vmul.f32 %v2056_v55, %v2056_v55  ;;  %v2061_v61 = vadd.f32 %v1394_v57, %v1393_v56 }
 0x1ae   :  { %v451_v62 = vadd.f32 %v450_v58, %v436_v60  ;;  %v415_v63 = vadd.f32 %v2061_v61, %v414_v59  ;;  %v437_v0 = vmul.f32 %v2061_v61, %v2061_v61 }
 0x1b0   :  { %v452_v1 = vadd.f32 %v451_v62, %v437_v0  ;;  %v1396_v2 = vpop.f32.mrb[20].mxu0 }
 0x1b1   :  { %v1397_v3 = vpop.f32.mrb[21].mxu0 }
 0x1b2   :  { %v2066_v4 = vadd.f32 %v1397_v3, %v1396_v2  ;;  %v1399_v5 = vpop.f32.mrb[22].mxu0  ;;  %v476_v2 = vlaneseq }
 0x1b3   :  { %v1400_v6 = vpop.f32.mrb[23].mxu0 }
 0x1b4   :  { %v416_v7 = vadd.f32 %v2066_v4, %v415_v63  ;;  %v438_v8 = vmul.f32 %v2066_v4, %v2066_v4  ;;  %v2071_v9 = vadd.f32 %v1400_v6, %v1399_v5  ;;  %v477_v3 = vshrl.u32 %v476_v2, 7  ;;  %v405_v5 = vld [vmem:[#allocation7] sm:$0x1] }
 0x1b6   :  { %v453_v11 = vadd.f32 %v452_v1, %v438_v8  ;;  %v417_v12 = vadd.f32 %v2071_v9, %v416_v7  ;;  %v439_v14 = vmul.f32 %v2071_v9, %v2071_v9  ;;  %v2092_v6 = vsub.s32 0, %v477_v3 }
 0x1b8   :  { %v454_v15 = vadd.f32 %v453_v11, %v439_v14  ;;  %v1402_v17 = vpop.f32.mrb[24].mxu0  ;;  %v406_v11 = vld [vmem:[#allocation8] sm:$0x1] }
 0x1b9   :  { %v1403_v18 = vpop.f32.mrb[25].mxu0 }
 0x1ba   :  { %v2076_v20 = vadd.f32 %v1403_v18, %v1402_v17  ;;  %v1405_v21 = vpop.f32.mrb[26].mxu0 }
 0x1bb   :  { %v1406_v22 = vpop.f32.mrb[27].mxu0 }
 0x1bc   :  { %v418_v23 = vadd.f32 %v2076_v20, %v417_v12  ;;  %v440_v24 = vmul.f32 %v2076_v20, %v2076_v20  ;;  %v2081_v25 = vadd.f32 %v1406_v22, %v1405_v21 }
 0x1be   :  { %v455_v26 = vadd.f32 %v454_v15, %v440_v24  ;;  %v419_v27 = vadd.f32 %v2081_v25, %v418_v23  ;;  %v441_v29 = vmul.f32 %v2081_v25, %v2081_v25 }
 0x1c0   :  { %v456_v30 = vadd.f32 %v455_v26, %v441_v29  ;;  %v1408_v31 = vpop.f32.mrb[28].mxu0 }
 0x1c1   :  { %v1409_v32 = vpop.f32.mrb[29].mxu0 }
 0x1c2   :  { %v2086_v34 = vadd.f32 %v1409_v32, %v1408_v31  ;;  %v1411_v35 = vpop.f32.mrb[30].mxu0 }
 0x1c3   :  { %v1412_v36 = vpop.f32.mrb[31].mxu0 }
 0x1c4   :  { %v420_v37 = vadd.f32 %v2086_v34, %v419_v27  ;;  %v442_v38 = vmul.f32 %v2086_v34, %v2086_v34  ;;  %v1413_v39 = vadd.f32 %v1412_v36, %v1411_v35 }
 0x1c6   :  { %v457_v40 = vadd.f32 %v456_v30, %v442_v38  ;;  %v421_v41 = vadd.f32 %v1413_v39, %v420_v37  ;;  %v443_v43 = vmul.f32 %v1413_v39, %v1413_v39 }
 0x1c8   :  { %v422_v44 = vrot.slane %v421_v41, 4  ;;  %v458_v45 = vadd.f32 %v457_v40, %v443_v43 }
 0x1ca   :  { %v423_v46 = vadd.f32 %v422_v44, %v421_v41  ;;  %v459_v48 = vrot.slane %v458_v45, 4 }
 0x1cc   :  { %v424_v49 = vrot.slane %v423_v46, 2  ;;  %v460_v50 = vadd.f32 %v459_v48, %v458_v45 }
 0x1ce   :  { %v425_v51 = vadd.f32 %v424_v49, %v423_v46  ;;  %v461_v52 = vrot.slane %v460_v50, 2 }
 0x1d0   :  { %v426_v53 = vrot.slane %v425_v51, 1  ;;  %v462_v54 = vadd.f32 %v461_v52, %v460_v50 }
 0x1d2   :  { %v427_v56 = vadd.f32 %v426_v53, %v425_v51  ;;  %v463_v57 = vrot.slane %v462_v54, 1 }
 0x1d4   :  { %v464_v58 = vadd.f32 %v463_v57, %v462_v54  ;;  %v465_v59 = vmul.f32 0.0078125, %v427_v56 }
 0x1d6   :  { %v466_v60 = vmul.f32 0.0078125, %v464_v58  ;;  %v467_v62 = vmul.f32 %v465_v59, %v465_v59 }
 0x1d8   :  { %v468_v63 = vsub.f32 %v466_v60, %v467_v62 }
 0x1da   :  { %v469_v0 = vmax.f32 %v468_v63, 0.0 }
 0x1dc   :  { %v470_v1 = vadd.f32 1e-05, %v469_v0 }
 0x1de   :  { %1557 = vrsqrt.f32 %v470_v1 }
 0x1e8   :  { %v1558_v7 = vpop.eup %1557 }
 0x1e9   :  { %v472_v8 = vmul.f32 %v1558_v7, %v405_v5 }
 0x1eb   :  { %v473_v12 = vmul.f32 %v472_v8, %v465_v59  ;;  %v479_v14 = vrot.slane %v472_v8, %v2092_v6 }
 0x1ed   :  { %v474_v15 = vsub.f32 %v406_v11, %v473_v12  ;;  %v496_v17 = vmul.f32 %v1413_v39, %v479_v14  ;;  %v481_v18 = vmul.f32 %v2016_v10, %v479_v14  ;;  %v482_v21 = vmul.f32 %v2018_v13, %v479_v14  ;;  %v1551_v12 = vld [vmem:[#allocation14 + $0x10] sm:$0xff]  }
 0x1ee   :  { %v483_v22 = vmul.f32 %v2020_v16, %v479_v14  ;;  %v484_v23 = vmul.f32 %v2022_v19, %v479_v14  ;;  %v485_v24 = vmul.f32 %v2033_v28, %v479_v14  ;;  %v486_v26 = vmul.f32 %v2037_v33, %v479_v14 }
 0x1ef   :  { %v501_v27 = vrot.slane %v474_v15, %v2092_v6  ;;  %v487_v29 = vmul.f32 %v2045_v42, %v479_v14  ;;  %v488_v30 = vmul.f32 %v2050_v47, %v479_v14  ;;  %v489_v31 = vmul.f32 %v2056_v55, %v479_v14  ;;  %v1553_v15 = vld [vmem:[#allocation14 + $0x20] sm:$0xff]  }
 0x1f0   :  { %v490_v10 = vmul.f32 %v2061_v61, %v479_v14  ;;  %v491_v13 = vmul.f32 %v2066_v4, %v479_v14  ;;  %v492_v16 = vmul.f32 %v2071_v9, %v479_v14  ;;  %v493_v19 = vmul.f32 %v2076_v20, %v479_v14 }
 0x1f1   :  { %v503_v32 = vadd.f32 %v501_v27, %v481_v18  ;;  %v504_v28 = vadd.f32 %v501_v27, %v482_v21  ;;  %v505_v35 = vadd.f32 %v501_v27, %v483_v22  ;;  %v506_v33 = vadd.f32 %v501_v27, %v484_v23  ;;  %v1555_v18 = vld [vmem:[#allocation14 + $0x30] sm:$0xff]   ;;  %v1556_v21 = vld [vmem:[#allocation14 + $0x38] sm:$0xff]  }
 0x1f2   :  { %v507_v36 = vadd.f32 %v501_v27, %v485_v24  ;;  %v508_v37 = vadd.f32 %v501_v27, %v486_v26  ;;  %v509_v38 = vadd.f32 %v501_v27, %v487_v29  ;;  %v510_v42 = vadd.f32 %v501_v27, %v488_v30 }
 0x1f3   :  { %v519_v39 = vmax.f32 %v503_v32, 0.0  ;;  %v520_v47 = vmax.f32 %v504_v28, 0.0  ;;  %v521_v40 = vmax.f32 %v505_v35, 0.0  ;;  %v522_v55 = vmax.f32 %v506_v33, 0.0 }
 0x1f4   :  { %v523_v41 = vmax.f32 %v507_v36, 0.0  ;;  %v524_v61 = vmax.f32 %v508_v37, 0.0  ;;  %v525_v43 = vmax.f32 %v509_v38, 0.0  ;;  %v526_v4 = vmax.f32 %v510_v42, 0.0 }
 0x1f5   :  { %v535_v44 = vpack.c.bf16 %v520_v47, %v519_v39  ;;  %v536_v9 = vpack.c.bf16 %v522_v55, %v521_v40  ;;  %v511_v45 = vadd.f32 %v501_v27, %v489_v31  ;;  %v512_v20 = vadd.f32 %v501_v27, %v490_v10 }
 0x1f6   :  { %v537_v46 = vpack.c.bf16 %v524_v61, %v523_v41  ;;  %v538_v48 = vpack.c.bf16 %v526_v4, %v525_v43  ;;  %v513_v49 = vadd.f32 %v501_v27, %v491_v13  ;;  %v514_v50 = vadd.f32 %v501_v27, %v492_v16 }
 0x1f7   :  { %1462 = vmatprep.mubr.bf16.mxu1 %v535_v44  ;;  %v527_v51 = vmax.f32 %v511_v45, 0.0  ;;  %v528_v52 = vmax.f32 %v512_v20, 0.0  ;;  %v494_v53 = vmul.f32 %v2081_v25, %v479_v14  ;;  %v515_v54 = vadd.f32 %v501_v27, %v493_v19  ;;  %v1549_v25 = vld [vmem:[#allocation14] sm:$0xff]  }
 0x1f8   :  { %1463 = vmatmul.mubr.bf16.vlgmr.msra.gmra.mrb[0].mxu1 %v536_v9  ;;  %v529_v56 = vmax.f32 %v513_v49, 0.0  ;;  %v530_v57 = vmax.f32 %v514_v50, 0.0  ;;  %v495_v58 = vmul.f32 %v2086_v34, %v479_v14  ;;  %v518_v59 = vadd.f32 %v501_v27, %v496_v17  ;;  %1478 = vmatprep.subr.bf16.mxu1 %v1549_v25  ;;  %v1550_v34 = vld [vmem:[#allocation14 + $0x8] sm:$0xff]   ;;  %v1552_v14 = vld [vmem:[#allocation14 + $0x18] sm:$0xff]  }
 0x1f9   :  { %1466 = vmatprep.mubr.bf16.mxu1 %v537_v46  ;;  %v539_v60 = vpack.c.bf16 %v528_v52, %v527_v51  ;;  %v516_v62 = vadd.f32 %v501_v27, %v494_v53  ;;  %v531_v63 = vmax.f32 %v515_v54, 0.0  ;;  %1479 = vmatpush3.bf16.msra.mxu1 %v1549_v25  ;;  %v1554_v17 = vld [vmem:[#allocation14 + $0x28] sm:$0xff]  }
 0x1fa   :  { %v540_v0 = vpack.c.bf16 %v530_v57, %v529_v56  ;;  %v517_v1 = vadd.f32 %v501_v27, %v495_v58  ;;  %v534_v3 = vmax.f32 %v518_v59, 0.0  ;;  %1480 = vmatprep.subr.bf16.mxu1 %v1550_v34 }
 0x1fb   :  { %v532_v5 = vmax.f32 %v516_v62, 0.0 }
 0x1fc   :  { %v533_v7 = vmax.f32 %v517_v1, 0.0 }
 0x1fd   :  { %v541_v8 = vpack.c.bf16 %v532_v5, %v531_v63  ;;  %1481 = vmatpush3.bf16.msra.mxu1 %v1550_v34 }
 0x1fe   :  { %v542_v11 = vpack.c.bf16 %v534_v3, %v533_v7  ;;  %1482 = vmatprep.subr.bf16.mxu1 %v1551_v12 }
 0x200   :  { %1467 = vmatmul.mubr.bf16.gmra.mrb[4].mxu1 %v538_v48 }
 0x201   :  { %1470 = vmatprep.mubr.bf16.mxu1 %v539_v60  ;;  %1483 = vmatpush3.bf16.msra.mxu1 %v1551_v12 }
 0x202   :  { %1484 = vmatprep.subr.bf16.mxu1 %v1552_v14 }
 0x205   :  { %1485 = vmatpush3.bf16.msra.mxu1 %v1552_v14 }
 0x206   :  { %1486 = vmatprep.subr.bf16.mxu1 %v1553_v15 }
 0x208   :  { %1471 = vmatmul.mubr.bf16.gmra.mrb[8].mxu1 %v540_v0 }
 0x209   :  { %1474 = vmatprep.mubr.bf16.mxu1 %v541_v8  ;;  %1487 = vmatpush3.bf16.msra.mxu1 %v1553_v15 }
 0x20a   :  { %1488 = vmatprep.subr.bf16.mxu1 %v1554_v17 }
 0x20d   :  { %1489 = vmatpush3.bf16.msra.mxu1 %v1554_v17 }
 0x20e   :  { %1490 = vmatprep.subr.bf16.mxu1 %v1555_v18 }
 0x210   :  { %1475 = vmatmul.mubr.bf16.gmra.mrb[12].mxu1 %v542_v11 }
 0x211   :  { %1491 = vmatpush3.bf16.msra.mxu1 %v1555_v18 }
 0x212   :  { %1492 = vmatprep.subr.bf16.mxu1 %v1556_v21 }
 0x215   :  { %1493 = vmatpush3.bf16.msra.mxu1 %v1556_v21 }
 0x2cb   :  { %v2111_v22 = vpop.f32.mrb[0].mxu1 }
 0x2cc   :  { %v2113_v23 = vpop.f32.mrb[1].mxu1  ;;  %v729_v31 = vmul.f32 %v2111_v22, %v2111_v22 }
 0x2cd   :  { %v2115_v24 = vpop.f32.mrb[2].mxu1  ;;  %v727_v27 = vmul.f32 %v2113_v23, %v2113_v23 }
 0x2ce   :  { %v2117_v26 = vpop.f32.mrb[3].mxu1  ;;  %v730_v16 = vmul.f32 %v2115_v24, %v2115_v24 }
 0x2cf   :  { %v706_v29 = vadd.f32 %v2117_v26, %v2113_v23  ;;  %v728_v30 = vmul.f32 %v2117_v26, %v2117_v26 }
 0x2d1   :  { %v707_v10 = vadd.f32 %v2111_v22, %v706_v29  ;;  %v743_v13 = vadd.f32 %v728_v30, %v727_v27 }
 0x2d3   :  { %v744_v19 = vadd.f32 %v743_v13, %v729_v31  ;;  %v2130_v32 = vpop.f32.mrb[4].mxu1  ;;  %v708_v28 = vadd.f32 %v2115_v24, %v707_v10 }
 0x2d4   :  { %v2133_v35 = vpop.f32.mrb[5].mxu1  ;;  %v733_v55 = vmul.f32 %v2130_v32, %v2130_v32 }
 0x2d5   :  { %v709_v33 = vadd.f32 %v708_v28, %v2133_v35  ;;  %v731_v36 = vmul.f32 %v2133_v35, %v2133_v35  ;;  %v745_v37 = vadd.f32 %v744_v19, %v730_v16  ;;  %v2138_v38 = vpop.f32.mrb[6].mxu1 }
 0x2d6   :  { %v2140_v42 = vpop.f32.mrb[7].mxu1  ;;  %v734_v43 = vmul.f32 %v2138_v38, %v2138_v38 }
 0x2d7   :  { %v746_v39 = vadd.f32 %v745_v37, %v731_v36  ;;  %v710_v47 = vadd.f32 %v709_v33, %v2140_v42  ;;  %v732_v40 = vmul.f32 %v2140_v42, %v2140_v42 }
 0x2d9   :  { %v711_v41 = vadd.f32 %v2130_v32, %v710_v47  ;;  %v747_v61 = vadd.f32 %v746_v39, %v732_v40 }
 0x2db   :  { %v748_v4 = vadd.f32 %v747_v61, %v733_v55  ;;  %v2150_v44 = vpop.f32.mrb[8].mxu1  ;;  %v712_v9 = vadd.f32 %v2138_v38, %v711_v41 }
 0x2dc   :  { %v2153_v45 = vpop.f32.mrb[9].mxu1  ;;  %v737_v54 = vmul.f32 %v2150_v44, %v2150_v44 }
 0x2dd   :  { %v713_v20 = vadd.f32 %v712_v9, %v2153_v45  ;;  %v735_v46 = vmul.f32 %v2153_v45, %v2153_v45  ;;  %v749_v48 = vadd.f32 %v748_v4, %v734_v43  ;;  %v2158_v49 = vpop.f32.mrb[10].mxu1  ;;  %v704_v43 = vld [vmem:[#allocation11] sm:$0x1] }
 0x2de   :  { %v2160_v50 = vpop.f32.mrb[11].mxu1  ;;  %v738_v58 = vmul.f32 %v2158_v49, %v2158_v49 }
 0x2df   :  { %v750_v51 = vadd.f32 %v749_v48, %v735_v46  ;;  %v714_v52 = vadd.f32 %v713_v20, %v2160_v50  ;;  %v736_v53 = vmul.f32 %v2160_v50, %v2160_v50  ;;  %v705_v20 = vld [vmem:[#allocation13] sm:$0x1] }
 0x2e1   :  { %v715_v56 = vadd.f32 %v2150_v44, %v714_v52  ;;  %v751_v57 = vadd.f32 %v750_v51, %v736_v53 }
 0x2e3   :  { %v752_v59 = vadd.f32 %v751_v57, %v737_v54  ;;  %v2170_v60 = vpop.f32.mrb[12].mxu1  ;;  %v716_v62 = vadd.f32 %v2158_v49, %v715_v56 }
 0x2e4   :  { %v689_v63 = vpop.f32.mrb[13].mxu1  ;;  %v741_v34 = vmul.f32 %v2170_v60, %v2170_v60 }
 0x2e5   :  { %v717_v0 = vadd.f32 %v716_v62, %v689_v63  ;;  %v739_v1 = vmul.f32 %v689_v63, %v689_v63  ;;  %v753_v3 = vadd.f32 %v752_v59, %v738_v58  ;;  %v2173_v5 = vpop.f32.mrb[14].mxu1 }
 0x2e6   :  { %v692_v7 = vpop.f32.mrb[15].mxu1  ;;  %v742_v15 = vmul.f32 %v2173_v5, %v2173_v5 }
 0x2e7   :  { %v754_v8 = vadd.f32 %v753_v3, %v739_v1  ;;  %v718_v11 = vadd.f32 %v717_v0, %v692_v7  ;;  %v740_v25 = vmul.f32 %v692_v7, %v692_v7 }
 0x2e9   :  { %v719_v12 = vadd.f32 %v2170_v60, %v718_v11  ;;  %v755_v14 = vadd.f32 %v754_v8, %v740_v25 }
 0x2eb   :  { %v720_v17 = vadd.f32 %v2173_v5, %v719_v12  ;;  %v756_v18 = vadd.f32 %v755_v14, %v741_v34 }
 0x2ed   :  { %v721_v21 = vrot.slane %v720_v17, 4  ;;  %v757_v27 = vadd.f32 %v756_v18, %v742_v15 }
 0x2ef   :  { %v722_v29 = vadd.f32 %v721_v21, %v720_v17  ;;  %v758_v30 = vrot.slane %v757_v27, 4 }
 0x2f1   :  { %v723_v31 = vrot.slane %v722_v29, 2  ;;  %v759_v10 = vadd.f32 %v758_v30, %v757_v27 }
 0x2f3   :  { %v724_v13 = vadd.f32 %v723_v31, %v722_v29  ;;  %v760_v16 = vrot.slane %v759_v10, 2 }
 0x2f5   :  { %v725_v19 = vrot.slane %v724_v13, 1  ;;  %v761_v28 = vadd.f32 %v760_v16, %v759_v10 }
 0x2f7   :  { %v726_v33 = vadd.f32 %v725_v19, %v724_v13  ;;  %v762_v36 = vrot.slane %v761_v28, 1 }
 0x2f9   :  { %v763_v37 = vadd.f32 %v762_v36, %v761_v28  ;;  %v764_v39 = vmul.f32 0.0078125, %v726_v33 }
 0x2fb   :  { %v765_v47 = vmul.f32 0.0078125, %v763_v37  ;;  %v766_v40 = vmul.f32 %v764_v39, %v764_v39 }
 0x2fd   :  { %v767_v55 = vsub.f32 %v765_v47, %v766_v40 }
 0x2ff   :  { %v768_v41 = vmax.f32 %v767_v55, 0.0 }
 0x301   :  { %v769_v61 = vadd.f32 1e-05, %v768_v41 }
 0x303   :  { %1559 = vrsqrt.f32 %v769_v61 }
 0x30d   :  { %v1560_v4 = vpop.eup %1559 }
 0x30e   :  { %v771_v9 = vmul.f32 %v1560_v4, %v704_v43 }
 0x310   :  { %v772_v46 = vmul.f32 %v771_v9, %v764_v39  ;;  %v778_v48 = vrot.slane %v771_v9, %v2092_v6 }
 0x312   :  { %v773_v51 = vsub.f32 %v705_v20, %v772_v46  ;;  %v793_v52 = vmul.f32 %v778_v48, %v692_v7  ;;  %v780_v53 = vmul.f32 %v778_v48, %v2113_v23  ;;  %v781_v54 = vmul.f32 %v778_v48, %v2117_v26 }
 0x313   :  { %v782_v56 = vmul.f32 %v2111_v22, %v778_v48  ;;  %v783_v57 = vmul.f32 %v2115_v24, %v778_v48  ;;  %v784_v58 = vmul.f32 %v778_v48, %v2133_v35  ;;  %v785_v59 = vmul.f32 %v778_v48, %v2140_v42 }
 0x314   :  { %v800_v62 = vrot.slane %v773_v51, %v2092_v6  ;;  %v786_v0 = vmul.f32 %v2130_v32, %v778_v48  ;;  %v787_v1 = vmul.f32 %v2138_v38, %v778_v48  ;;  %v788_v3 = vmul.f32 %v778_v48, %v2153_v45 }
 0x315   :  { %v789_v23 = vmul.f32 %v778_v48, %v2160_v50  ;;  %v790_v26 = vmul.f32 %v2150_v44, %v778_v48  ;;  %v791_v22 = vmul.f32 %v2158_v49, %v778_v48  ;;  %v792_v7 = vmul.f32 %v778_v48, %v689_v63 }
 0x316   :  { %v815_v24 = vadd.f32 %v800_v62, %v793_v52  ;;  %v802_v8 = vadd.f32 %v800_v62, %v780_v53  ;;  %v803_v35 = vadd.f32 %v800_v62, %v781_v54  ;;  %v804_v11 = vadd.f32 %v800_v62, %v782_v56 }
 0x317   :  { %v805_v42 = vadd.f32 %v800_v62, %v783_v57  ;;  %v806_v25 = vadd.f32 %v800_v62, %v784_v58  ;;  %v807_v6 = vadd.f32 %v800_v62, %v785_v59  ;;  %v808_v34 = vadd.f32 %v800_v62, %v786_v0 }
 0x318   :  { %v818_v32 = vmax.f32 %v802_v8, 0.0  ;;  %v819_v12 = vmax.f32 %v803_v35, 0.0  ;;  %v820_v38 = vmax.f32 %v804_v11, 0.0  ;;  %v809_v14 = vadd.f32 %v800_v62, %v787_v1 }
 0x319   :  { %v821_v45 = vmax.f32 %v805_v42, 0.0  ;;  %v822_v15 = vmax.f32 %v806_v25, 0.0  ;;  %v823_v50 = vmax.f32 %v807_v6, 0.0  ;;  %v824_v17 = vmax.f32 %v808_v34, 0.0 }
 0x31a   :  { %v834_v44 = vpack.c.bf16 %v819_v12, %v818_v32  ;;  %v825_v18 = vmax.f32 %v809_v14, 0.0  ;;  %v810_v49 = vadd.f32 %v800_v62, %v788_v3  ;;  %v811_v63 = vadd.f32 %v800_v62, %v789_v23 }
 0x31b   :  { %v835_v21 = vpack.c.bf16 %v821_v45, %v820_v38  ;;  %v836_v27 = vpack.c.bf16 %v823_v50, %v822_v15  ;;  %v812_v29 = vadd.f32 %v800_v62, %v790_v26  ;;  %v813_v30 = vadd.f32 %v800_v62, %v791_v22 }
 0x31c   :  { %1494 = vmatprep.mubr.bf16.mxu1 %v834_v44  ;;  %v837_v31 = vpack.c.bf16 %v825_v18, %v824_v17  ;;  %v826_v10 = vmax.f32 %v810_v49, 0.0  ;;  %v827_v13 = vmax.f32 %v811_v63, 0.0  ;;  %v814_v16 = vadd.f32 %v800_v62, %v792_v7 }
 0x31d   :  { %1495 = vmatmul.mubr.bf16.vlgmr.msra.gmra.mrb[16].mxu1 %v835_v21  ;;  %v828_v19 = vmax.f32 %v812_v29, 0.0  ;;  %v829_v28 = vmax.f32 %v813_v30, 0.0  ;;  %v831_v33 = vmax.f32 %v815_v24, 0.0  ;;  %v794_v36 = vmul.f32 %v2170_v60, %v778_v48 }
 0x31e   :  { %1498 = vmatprep.mubr.bf16.mxu1 %v836_v27  ;;  %v838_v37 = vpack.c.bf16 %v827_v13, %v826_v10  ;;  %v830_v39 = vmax.f32 %v814_v16, 0.0  ;;  %v795_v47 = vmul.f32 %v2173_v5, %v778_v48 }
 0x31f   :  { %v839_v40 = vpack.c.bf16 %v829_v28, %v828_v19  ;;  %v816_v55 = vadd.f32 %v800_v62, %v794_v36 }
 0x320   :  { %v840_v41 = vpack.c.bf16 %v831_v33, %v830_v39  ;;  %v817_v61 = vadd.f32 %v800_v62, %v795_v47 }
 0x321   :  { %v832_v43 = vmax.f32 %v816_v55, 0.0 }
 0x322   :  { %v833_v4 = vmax.f32 %v817_v61, 0.0 }
 0x324   :  { %v841_v9 = vpack.c.bf16 %v833_v4, %v832_v43 }
 0x325   :  { %1499 = vmatmul.mubr.bf16.gmra.mrb[20].mxu1 %v837_v31 }
 0x326   :  { %1502 = vmatprep.mubr.bf16.mxu1 %v838_v37 }
 0x32d   :  { %1503 = vmatmul.mubr.bf16.gmra.mrb[24].mxu1 %v839_v40 }
 0x32e   :  { %1506 = vmatprep.mubr.bf16.mxu1 %v840_v41 }
 0x335   :  { %1507 = vmatmul.mubr.bf16.gmra.mrb[28].mxu1 %v841_v9 }
 0x3f0   :  { %v2197_v20 = vpop.f32.mrb[16].mxu1 }
 0x3f1   :  { %v2199_v60 = vpop.f32.mrb[17].mxu1  ;;  %v1026_v53 = vmul.f32 %v2197_v20, %v2197_v20 }
 0x3f2   :  { %v2201_v46 = vpop.f32.mrb[18].mxu1  ;;  %v1024_v5 = vmul.f32 %v2199_v60, %v2199_v60 }
 0x3f3   :  { %v2203_v51 = vpop.f32.mrb[19].mxu1  ;;  %v1027_v57 = vmul.f32 %v2201_v46, %v2201_v46 }
 0x3f4   :  { %v1003_v48 = vadd.f32 %v2203_v51, %v2199_v60  ;;  %v1025_v52 = vmul.f32 %v2203_v51, %v2203_v51 }
 0x3f6   :  { %v1004_v54 = vadd.f32 %v2197_v20, %v1003_v48  ;;  %v1040_v56 = vadd.f32 %v1025_v52, %v1024_v5 }
 0x3f8   :  { %v1041_v58 = vadd.f32 %v1040_v56, %v1026_v53  ;;  %v2216_v59 = vpop.f32.mrb[20].mxu1  ;;  %v1005_v62 = vadd.f32 %v2201_v46, %v1004_v54 }
 0x3f9   :  { %v2219_v0 = vpop.f32.mrb[21].mxu1  ;;  %v1030_v35 = vmul.f32 %v2216_v59, %v2216_v59 }
 0x3fa   :  { %v1006_v1 = vadd.f32 %v1005_v62, %v2219_v0  ;;  %v1028_v3 = vmul.f32 %v2219_v0, %v2219_v0  ;;  %v1042_v23 = vadd.f32 %v1041_v58, %v1027_v57  ;;  %v2224_v26 = vpop.f32.mrb[22].mxu1 }
 0x3fb   :  { %v2226_v22 = vpop.f32.mrb[23].mxu1  ;;  %v1031_v25 = vmul.f32 %v2224_v26, %v2224_v26 }
 0x3fc   :  { %v1043_v7 = vadd.f32 %v1042_v23, %v1028_v3  ;;  %v1007_v24 = vadd.f32 %v1006_v1, %v2226_v22  ;;  %v1029_v8 = vmul.f32 %v2226_v22, %v2226_v22 }
 0x3fe   :  { %v1008_v11 = vadd.f32 %v2216_v59, %v1007_v24  ;;  %v1044_v42 = vadd.f32 %v1043_v7, %v1029_v8 }
 0x400   :  { %v1045_v6 = vadd.f32 %v1044_v42, %v1030_v35  ;;  %v2236_v34 = vpop.f32.mrb[24].mxu1  ;;  %v1009_v32 = vadd.f32 %v2224_v26, %v1008_v11  ;;  %v1103_v42 = vand.u32 127, %v476_v2 }
 0x401   :  { %v2239_v12 = vpop.f32.mrb[25].mxu1  ;;  %v1034_v49 = vmul.f32 %v2236_v34, %v2236_v34 }
 0x402   :  { %v1010_v38 = vadd.f32 %v1009_v32, %v2239_v12  ;;  %v1032_v14 = vmul.f32 %v2239_v12, %v2239_v12  ;;  %v1046_v45 = vadd.f32 %v1045_v6, %v1031_v25  ;;  %v2244_v15 = vpop.f32.mrb[26].mxu1  ;;  %vm1104_vm0 = vcmp.lt.s32.totalorder %v1103_v42, 35 }
 0x403   :  { %v975_v50 = vpop.f32.mrb[27].mxu1  ;;  %v1035_v27 = vmul.f32 %v2244_v15, %v2244_v15 }
 0x404   :  { %v1047_v17 = vadd.f32 %v1046_v45, %v1032_v14  ;;  %v1011_v44 = vadd.f32 %v1010_v38, %v975_v50  ;;  %v1033_v18 = vmul.f32 %v975_v50, %v975_v50 }
 0x406   :  { %v1012_v63 = vadd.f32 %v2236_v34, %v1011_v44  ;;  %v1048_v21 = vadd.f32 %v1047_v17, %v1033_v18 }
 0x408   :  { %v1049_v29 = vadd.f32 %v1048_v21, %v1034_v49  ;;  %v2251_v30 = vpop.f32.mrb[28].mxu1  ;;  %v1013_v31 = vadd.f32 %v2244_v15, %v1012_v63 }
 0x409   :  { %v988_v10 = vpop.f32.mrb[29].mxu1  ;;  %v1038_v47 = vmul.f32 %v2251_v30, %v2251_v30 }
 0x40a   :  { %v1014_v13 = vadd.f32 %v1013_v31, %v988_v10  ;;  %v1036_v16 = vmul.f32 %v988_v10, %v988_v10  ;;  %v1050_v19 = vadd.f32 %v1049_v29, %v1035_v27  ;;  %v2254_v28 = vpop.f32.mrb[30].mxu1 }
 0x40b   :  { %v991_v33 = vpop.f32.mrb[31].mxu1  ;;  %v1039_v41 = vmul.f32 %v2254_v28, %v2254_v28 }
 0x40c   :  { %v1051_v36 = vadd.f32 %v1050_v19, %v1036_v16  ;;  %v1015_v37 = vadd.f32 %v1014_v13, %v991_v33  ;;  %v1037_v39 = vmul.f32 %v991_v33, %v991_v33 }
 0x40e   :  { %v1016_v40 = vadd.f32 %v2251_v30, %v1015_v37  ;;  %v1052_v55 = vadd.f32 %v1051_v36, %v1037_v39 }
 0x410   :  { %v1017_v61 = vadd.f32 %v2254_v28, %v1016_v40  ;;  %v1053_v43 = vadd.f32 %v1052_v55, %v1038_v47 }
 0x412   :  { %v1018_v4 = vrot.slane %v1017_v61, 4  ;;  %v1054_v9 = vadd.f32 %v1053_v43, %v1039_v41 }
 0x414   :  { %v1019_v5 = vadd.f32 %v1018_v4, %v1017_v61  ;;  %v1055_v48 = vrot.slane %v1054_v9, 4 }
 0x416   :  { %v1020_v52 = vrot.slane %v1019_v5, 2  ;;  %v1056_v53 = vadd.f32 %v1055_v48, %v1054_v9 }
 0x418   :  { %v1021_v54 = vadd.f32 %v1020_v52, %v1019_v5  ;;  %v1057_v56 = vrot.slane %v1056_v53, 2 }
 0x41a   :  { %v1022_v57 = vrot.slane %v1021_v54, 1  ;;  %v1058_v58 = vadd.f32 %v1057_v56, %v1056_v53 }
 0x41c   :  { %v1023_v62 = vadd.f32 %v1022_v57, %v1021_v54  ;;  %v1059_v1 = vrot.slane %v1058_v58, 1 }
 0x41e   :  { %v1060_v3 = vadd.f32 %v1059_v1, %v1058_v58  ;;  %v1061_v23 = vmul.f32 0.0078125, %v1023_v62 }
 0x420   :  { %v1062_v7 = vmul.f32 0.0078125, %v1060_v3  ;;  %v1063_v24 = vmul.f32 %v1061_v23, %v1061_v23 }
 0x422   :  { %v1064_v8 = vsub.f32 %v1062_v7, %v1063_v24 }
 0x424   :  { %v1065_v35 = vmax.f32 %v1064_v8, 0.0 }
 0x426   :  { %v1066_v11 = vadd.f32 1e-05, %v1065_v35 }
 0x428   :  { %1561 = vrsqrt.f32 %v1066_v11 }
 0x432   :  { %v1562_v25 = vpop.eup %1561 }
 0x433   :  { %v1068_v6 = vmul.f32 %v1562_v25, %v1061_v23  ;;  %v1083_v32 = vmul.f32 %v1562_v25, %v991_v33  ;;  %v1072_v38 = vmul.f32 %v1562_v25, %v2197_v20  ;;  %v1070_v14 = vmul.f32 %v1562_v25, %v2199_v60 }
 0x434   :  { %v1073_v45 = vmul.f32 %v1562_v25, %v2201_v46  ;;  %v1071_v17 = vmul.f32 %v1562_v25, %v2203_v51  ;;  %v1075_v44 = vmul.f32 %v1562_v25, %v2226_v22  ;;  %v1074_v18 = vmul.f32 %v1562_v25, %v2219_v0 }
 0x435   :  { %v1069_v49 = vsub.f32 0.0, %v1068_v6  ;;  %v1077_v63 = vmul.f32 %v1562_v25, %v2224_v26  ;;  %v1076_v2 = vmul.f32 %v1562_v25, %v2216_v59  ;;  %v1079_v21 = vmul.f32 %v1562_v25, %v975_v50 }
 0x436   :  { %v1078_v27 = vmul.f32 %v1562_v25, %v2239_v12  ;;  %v1081_v20 = vmul.f32 %v1562_v25, %v2244_v15  ;;  %v1080_v60 = vmul.f32 %v1562_v25, %v2236_v34  ;;  %v1082_v29 = vmul.f32 %v1562_v25, %v988_v10 }
 0x437   :  { %v1088_v46 = vadd.f32 %v1072_v38, %v1069_v49  ;;  %v1086_v31 = vadd.f32 %v1070_v14, %v1069_v49  ;;  %v1089_v51 = vadd.f32 %v1073_v45, %v1069_v49  ;;  %v1087_v13 = vadd.f32 %v1071_v17, %v1069_v49 }
 0x438   :  { %v1091_v22 = vadd.f32 %v1075_v44, %v1069_v49  ;;  %v1090_v16 = vadd.f32 %v1074_v18, %v1069_v49  ;;  %v1093_v0 = vadd.f32 %v1077_v63, %v1069_v49  ;;  %v1092_v19 = vadd.f32 %v1076_v2, %v1069_v49 }
 0x439   :  { %v1107_v26 = vsel %vm1104_vm0, %v1088_v46, -1e+30  ;;  %v1105_v59 = vsel %vm1104_vm0, %v1086_v31, -1e+30  ;;  %v1108_v50 = vsel %vm1104_vm0, %v1089_v51, -1e+30  ;;  %v1095_v12 = vadd.f32 %v1079_v21, %v1069_v49 }
 0x43a   :  { %1125 = vmax.xlane.f32.xlu1 %v1107_v26  ;;  %1121 = vmax.xlane.f32.xlu0 %v1105_v59  ;;  %v1106_v34 = vsel %vm1104_vm0, %v1087_v13, -1e+30  ;;  %v1110_v15 = vsel %vm1104_vm0, %v1091_v22, -1e+30  ;;  %v1109_v10 = vsel %vm1104_vm0, %v1090_v16, -1e+30  ;;  %v1094_v33 = vadd.f32 %v1078_v27, %v1069_v49 }
 0x43b   :  { %v1112_v36 = vsel %vm1104_vm0, %v1093_v0, -1e+30  ;;  %v1111_v37 = vsel %vm1104_vm0, %v1092_v19, -1e+30  ;;  %v2283_v39 = vsel %vm1104_vm0, %v1095_v12, -1e+30  ;;  %v1097_v47 = vadd.f32 %v1081_v20, %v1069_v49 }
 0x43c   :  { %v2286_v40 = vsel %vm1104_vm0, %v1094_v33, -1e+30  ;;  %v1096_v55 = vadd.f32 %v1080_v60, %v1069_v49  ;;  %v1099_v41 = vadd.f32 %v1083_v32, %v1069_v49  ;;  %v1098_v61 = vadd.f32 %v1082_v29, %v1069_v49 }
 0x43d   :  { %v2289_v43 = vsel %vm1104_vm0, %v1097_v47, -1e+30  ;;  %v1085_v4 = vmul.f32 %v1562_v25, %v2254_v28  ;;  %v1084_v9 = vmul.f32 %v1562_v25, %v2251_v30 }
 0x43e   :  { %1127 = vmax.xlane.f32.xlu1 %v1108_v50  ;;  %1123 = vmax.xlane.f32.xlu0 %v1106_v34  ;;  %v2294_v5 = vsel %vm1104_vm0, %v1096_v55, -1e+30  ;;  %v2297_v48 = vsel %vm1104_vm0, %v1099_v41, -1e+30  ;;  %v2300_v52 = vsel %vm1104_vm0, %v1098_v61, -1e+30 }
 0x43f   :  { %v1101_v53 = vadd.f32 %v1085_v4, %v1069_v49  ;;  %v1100_v54 = vadd.f32 %v1084_v9, %v1069_v49 }
 0x441   :  { %v2303_v56 = vsel %vm1104_vm0, %v1101_v53, -1e+30  ;;  %v2306_v28 = vsel %vm1104_vm0, %v1100_v54, -1e+30 }
 0x442   :  { %1131 = vmax.xlane.f32.xlu1 %v1110_v15  ;;  %1129 = vmax.xlane.f32.xlu0 %v1109_v10 }
 0x446   :  { %1135 = vmax.xlane.f32.xlu1 %v1112_v36  ;;  %1133 = vmax.xlane.f32.xlu0 %v1111_v37 }
 0x44a   :  { %1139 = vmax.xlane.f32.xlu1 %v2283_v39  ;;  %1137 = vmax.xlane.f32.xlu0 %v2286_v40 }
 0x44e   :  { %1143 = vmax.xlane.f32.xlu1 %v2289_v43  ;;  %1141 = vmax.xlane.f32.xlu0 %v2294_v5 }
 0x452   :  { %1147 = vmax.xlane.f32.xlu1 %v2297_v48  ;;  %1145 = vmax.xlane.f32.xlu0 %v2300_v52 }
 0x456   :  { %1151 = vmax.xlane.f32.xlu1 %v2303_v56  ;;  %1149 = vmax.xlane.f32.xlu0 %v2306_v28 }
 0x4c7   :  { %v1126_v30 = vpop.xlane.xlu1 %1125  ;;  %v1122_v57 = vpop.xlane.xlu0 %1121 }
 0x4c8   :  { %v2316_v58 = vsub.f32 %v1107_v26, %v1126_v30  ;;  %v2318_v62 = vsub.f32 %v1105_v59, %v1122_v57 }
 0x4ca   :  { %v1169_v1 = vmul.f32 1.442695, %v2318_v62  ;;  %v1173_v7 = vmul.f32 1.442695, %v2316_v58 }
 0x4cb   :  { %v1128_v3 = vpop.xlane.xlu1 %1127  ;;  %v1124_v23 = vpop.xlane.xlu0 %1123 }
 0x4cc   :  { %v2322_v24 = vsub.f32 %v1108_v50, %v1128_v3  ;;  %v2324_v8 = vsub.f32 %v1106_v34, %v1124_v23  ;;  %1563 = vpow2.f32 %v1169_v1 }
 0x4cd   :  { %1565 = vpow2.f32 %v1173_v7 }
 0x4ce   :  { %v1171_v35 = vmul.f32 1.442695, %v2324_v8  ;;  %v1175_v25 = vmul.f32 1.442695, %v2322_v24 }
 0x4cf   :  { %v1132_v11 = vpop.xlane.xlu1 %1131  ;;  %v1130_v42 = vpop.xlane.xlu0 %1129 }
 0x4d0   :  { %v2328_v6 = vsub.f32 %v1110_v15, %v1132_v11  ;;  %v2330_v32 = vsub.f32 %v1109_v10, %v1130_v42  ;;  %1567 = vpow2.f32 %v1171_v35 }
 0x4d1   :  { %1569 = vpow2.f32 %v1175_v25 }
 0x4d2   :  { %v1177_v38 = vmul.f32 1.442695, %v2330_v32  ;;  %v1179_v17 = vmul.f32 1.442695, %v2328_v6 }
 0x4d3   :  { %v1136_v14 = vpop.xlane.xlu1 %1135  ;;  %v1134_v45 = vpop.xlane.xlu0 %1133 }
 0x4d4   :  { %v2334_v44 = vsub.f32 %v1112_v36, %v1136_v14  ;;  %v2336_v18 = vsub.f32 %v1111_v37, %v1134_v45  ;;  %1571 = vpow2.f32 %v1177_v38 }
 0x4d5   :  { %1573 = vpow2.f32 %v1179_v17 }
 0x4d6   :  { %v1181_v49 = vmul.f32 1.442695, %v2336_v18  ;;  %v1564_v63 = vpop.eup %1563  ;;  %v1183_v27 = vmul.f32 1.442695, %v2334_v44 }
 0x4d7   :  { %v1140_v2 = vpop.xlane.xlu1 %1139  ;;  %v1138_v21 = vpop.xlane.xlu0 %1137  ;;  %1201 = vadd.xlane.f32.xlu0 %v1564_v63 }
 0x4d8   :  { %v2341_v20 = vsub.f32 %v2283_v39, %v1140_v2  ;;  %v2344_v60 = vsub.f32 %v2286_v40, %v1138_v21  ;;  %1575 = vpow2.f32 %v1181_v49  ;;  %v1566_v29 = vpop.eup %1565 }
 0x4d9   :  { %1577 = vpow2.f32 %v1183_v27 }
 0x4da   :  { %v1185_v46 = vmul.f32 1.442695, %v2344_v60  ;;  %v1568_v31 = vpop.eup %1567  ;;  %v1187_v22 = vmul.f32 1.442695, %v2341_v20 }
 0x4db   :  { %v1144_v51 = vpop.xlane.xlu1 %1143  ;;  %v1142_v13 = vpop.xlane.xlu0 %1141  ;;  %1205 = vadd.xlane.f32.xlu0 %v1566_v29  ;;  %1203 = vadd.xlane.f32.xlu1 %v1568_v31 }
 0x4dc   :  { %v2349_v16 = vsub.f32 %v2289_v43, %v1144_v51  ;;  %v2352_v0 = vsub.f32 %v2294_v5, %v1142_v13  ;;  %1579 = vpow2.f32 %v1185_v46  ;;  %v1570_v19 = vpop.eup %1569 }
 0x4dd   :  { %1581 = vpow2.f32 %v1187_v22 }
 0x4de   :  { %v1189_v26 = vmul.f32 1.442695, %v2352_v0  ;;  %v1572_v59 = vpop.eup %1571  ;;  %v1191_v34 = vmul.f32 1.442695, %v2349_v16 }
 0x4df   :  { %v1148_v50 = vpop.xlane.xlu1 %1147  ;;  %v1146_v12 = vpop.xlane.xlu0 %1145  ;;  %1207 = vadd.xlane.f32.xlu1 %v1570_v19  ;;  %1209 = vadd.xlane.f32.xlu0 %v1572_v59 }
 0x4e0   :  { %v2357_v15 = vsub.f32 %v2297_v48, %v1148_v50  ;;  %v2360_v10 = vsub.f32 %v2300_v52, %v1146_v12  ;;  %1583 = vpow2.f32 %v1189_v26  ;;  %v1574_v33 = vpop.eup %1573 }
 0x4e1   :  { %1585 = vpow2.f32 %v1191_v34 }
 0x4e2   :  { %v1193_v36 = vmul.f32 1.442695, %v2360_v10  ;;  %v1576_v37 = vpop.eup %1575  ;;  %v1195_v40 = vmul.f32 1.442695, %v2357_v15 }
 0x4e3   :  { %v1152_v39 = vpop.xlane.xlu1 %1151  ;;  %v1150_v47 = vpop.xlane.xlu0 %1149  ;;  %1211 = vadd.xlane.f32.xlu1 %v1574_v33  ;;  %1213 = vadd.xlane.f32.xlu0 %v1576_v37 }
 0x4e4   :  { %v2365_v55 = vsub.f32 %v2306_v28, %v1150_v47  ;;  %1587 = vpow2.f32 %v1193_v36  ;;  %v2368_v41 = vsub.f32 %v2303_v56, %v1152_v39  ;;  %v1578_v61 = vpop.eup %1577 }
 0x4e5   :  { %1589 = vpow2.f32 %v1195_v40 }
 0x4e6   :  { %v1197_v43 = vmul.f32 1.442695, %v2365_v55  ;;  %v1580_v4 = vpop.eup %1579  ;;  %v1199_v9 = vmul.f32 1.442695, %v2368_v41 }
 0x4e7   :  { %1215 = vadd.xlane.f32.xlu1 %v1578_v61  ;;  %1217 = vadd.xlane.f32.xlu0 %v1580_v4  ;;  %v1582_v5 = vpop.eup %1581 }
 0x4e8   :  { %1591 = vpow2.f32 %v1197_v43 }
 0x4e9   :  { %1593 = vpow2.f32 %v1199_v9 }
 0x4ea   :  { %v1584_v48 = vpop.eup %1583 }
 0x4eb   :  { %1219 = vadd.xlane.f32.xlu1 %v1582_v5  ;;  %1221 = vadd.xlane.f32.xlu0 %v1584_v48  ;;  %v1586_v52 = vpop.eup %1585 }
 0x4ee   :  { %v1588_v53 = vpop.eup %1587 }
 0x4ef   :  { %1223 = vadd.xlane.f32.xlu1 %v1586_v52  ;;  %1225 = vadd.xlane.f32.xlu0 %v1588_v53  ;;  %v1590_v54 = vpop.eup %1589 }
 0x4f2   :  { %v1592_v56 = vpop.eup %1591 }
 0x4f3   :  { %1227 = vadd.xlane.f32.xlu1 %v1590_v54  ;;  %1229 = vadd.xlane.f32.xlu0 %v1592_v56  ;;  %v1594_v28 = vpop.eup %1593 }
 0x4f7   :  { %1231 = vadd.xlane.f32.xlu1 %v1594_v28 }
 0x564   :  { %v1202_v30 = vpop.xlane.xlu0 %1201 }
 0x565   :  { %1595 = vlog2.f32 %v1202_v30 }
 0x568   :  { %v1204_v57 = vpop.xlane.xlu1 %1203  ;;  %v1206_v1 = vpop.xlane.xlu0 %1205 }
 0x569   :  { %1597 = vlog2.f32 %v1204_v57 }
 0x56a   :  { %1599 = vlog2.f32 %v1206_v1 }
 0x56c   :  { %v1208_v3 = vpop.xlane.xlu1 %1207  ;;  %v1210_v23 = vpop.xlane.xlu0 %1209 }
 0x56d   :  { %1601 = vlog2.f32 %v1208_v3 }
 0x56e   :  { %1603 = vlog2.f32 %v1210_v23 }
 0x56f   :  { %v1596_v7 = vpop.eup %1595 }
 0x570   :  { %v1234_v35 = vmul.f32 0.6931472, %v1596_v7  ;;  %v1212_v11 = vpop.xlane.xlu1 %1211  ;;  %v1214_v42 = vpop.xlane.xlu0 %1213 }
 0x571   :  { %1605 = vlog2.f32 %v1212_v11 }
 0x572   :  { %v1265_v25 = vsub.f32 %v2318_v62, %v1234_v35  ;;  %1607 = vlog2.f32 %v1214_v42 }
 0x573   :  { %v1598_v38 = vpop.eup %1597 }
 0x574   :  { %v1600_v14 = vpop.eup %1599  ;;  %1281 = vst [vmem:[#allocation16] sm:$0xff] %v1265_v25  ;;  %v1236_v45 = vmul.f32 0.6931472, %v1598_v38  ;;  %v1216_v17 = vpop.xlane.xlu1 %1215 }
 0x575   :  { %v1218_v49 = vpop.xlane.xlu0 %1217  ;;  %v1238_v63 = vmul.f32 0.6931472, %v1600_v14  ;;  %1609 = vlog2.f32 %v1216_v17 }
 0x576   :  { %v1266_v2 = vsub.f32 %v2324_v8, %v1236_v45  ;;  %1611 = vlog2.f32 %v1218_v49 }
 0x577   :  { %v1602_v21 = vpop.eup %1601  ;;  %v1267_v27 = vsub.f32 %v2316_v58, %v1238_v63 }
 0x578   :  { %v1604_v29 = vpop.eup %1603  ;;  %1282 = vst [vmem:[#allocation16 + $0x8] sm:$0xff] %v1266_v2  ;;  %v1240_v46 = vmul.f32 0.6931472, %v1602_v21  ;;  %v1220_v31 = vpop.xlane.xlu1 %1219 }
 0x579   :  { %v1222_v62 = vpop.xlane.xlu0 %1221  ;;  %1283 = vst [vmem:[#allocation16 + $0x10] sm:$0xff] %v1267_v27  ;;  %v1242_v51 = vmul.f32 0.6931472, %v1604_v29  ;;  %1613 = vlog2.f32 %v1220_v31 }
 0x57a   :  { %v1268_v13 = vsub.f32 %v2322_v24, %v1240_v46  ;;  %1615 = vlog2.f32 %v1222_v62 }
 0x57b   :  { %v1606_v22 = vpop.eup %1605  ;;  %v1269_v19 = vsub.f32 %v2330_v32, %v1242_v51 }
 0x57c   :  { %v1608_v26 = vpop.eup %1607  ;;  %1284 = vst [vmem:[#allocation16 + $0x18] sm:$0xff] %v1268_v13  ;;  %v1244_v8 = vmul.f32 0.6931472, %v1606_v22  ;;  %v1224_v59 = vpop.xlane.xlu1 %1223 }
 0x57d   :  { %v1226_v50 = vpop.xlane.xlu0 %1225  ;;  %1285 = vst [vmem:[#allocation16 + $0x20] sm:$0xff] %v1269_v19  ;;  %v1246_v58 = vmul.f32 0.6931472, %v1608_v26  ;;  %1617 = vlog2.f32 %v1224_v59 }
 0x57e   :  { %v1270_v12 = vsub.f32 %v2328_v6, %v1244_v8  ;;  %1619 = vlog2.f32 %v1226_v50 }
 0x57f   :  { %v1610_v34 = vpop.eup %1609  ;;  %v1271_v33 = vsub.f32 %v2336_v18, %v1246_v58 }
 0x580   :  { %v1612_v36 = vpop.eup %1611  ;;  %1286 = vst [vmem:[#allocation16 + $0x28] sm:$0xff] %v1270_v12  ;;  %v1248_v24 = vmul.f32 0.6931472, %v1610_v34  ;;  %v1228_v37 = vpop.xlane.xlu1 %1227 }
 0x581   :  { %v1230_v39 = vpop.xlane.xlu0 %1229  ;;  %1287 = vst [vmem:[#allocation16 + $0x30] sm:$0xff] %v1271_v33  ;;  %v1250_v32 = vmul.f32 0.6931472, %v1612_v36  ;;  %1621 = vlog2.f32 %v1228_v37 }
 0x582   :  { %v1272_v47 = vsub.f32 %v2334_v44, %v1248_v24  ;;  %1623 = vlog2.f32 %v1230_v39 }
 0x583   :  { %v1614_v40 = vpop.eup %1613  ;;  %v1273_v61 = vsub.f32 %v2344_v60, %v1250_v32 }
 0x584   :  { %v1616_v43 = vpop.eup %1615  ;;  %1288 = vst [vmem:[#allocation16 + $0x38] sm:$0xff] %v1272_v47  ;;  %v1252_v6 = vmul.f32 0.6931472, %v1614_v40  ;;  %v1232_v4 = vpop.xlane.xlu1 %1231 }
 0x585   :  { %1289 = vst [vmem:[#allocation16 + $0x40] sm:$0xff] %v1273_v61  ;;  %v1254_v18 = vmul.f32 0.6931472, %v1616_v43  ;;  %1625 = vlog2.f32 %v1232_v4 }
 0x586   :  { %v1274_v9 = vsub.f32 %v2341_v20, %v1252_v6 }
 0x587   :  { %v1618_v5 = vpop.eup %1617  ;;  %v1275_v48 = vsub.f32 %v2352_v0, %v1254_v18 }
 0x588   :  { %v1620_v52 = vpop.eup %1619  ;;  %1290 = vst [vmem:[#allocation16 + $0x48] sm:$0xff] %v1274_v9  ;;  %v1256_v53 = vmul.f32 0.6931472, %v1618_v5 }
 0x589   :  { %1291 = vst [vmem:[#allocation16 + $0x50] sm:$0xff] %v1275_v48  ;;  %v1258_v44 = vmul.f32 0.6931472, %v1620_v52 }
 0x58a   :  { %v1276_v54 = vsub.f32 %v2349_v16, %v1256_v53 }
 0x58b   :  { %v1622_v60 = vpop.eup %1621  ;;  %v1277_v56 = vsub.f32 %v2360_v10, %v1258_v44 }
 0x58c   :  { %v1624_v28 = vpop.eup %1623  ;;  %1292 = vst [vmem:[#allocation16 + $0x58] sm:$0xff] %v1276_v54  ;;  %v1260_v30 = vmul.f32 0.6931472, %v1622_v60 }
 0x58d   :  { %1293 = vst [vmem:[#allocation16 + $0x60] sm:$0xff] %v1277_v56  ;;  %v1262_v57 = vmul.f32 0.6931472, %v1624_v28 }
 0x58e   :  { %v1278_v20 = vsub.f32 %v2357_v15, %v1260_v30 }
 0x58f   :  { %v1626_v1 = vpop.eup %1625  ;;  %v1279_v0 = vsub.f32 %v2365_v55, %v1262_v57 }
 0x590   :  { %1294 = vst [vmem:[#allocation16 + $0x68] sm:$0xff] %v1278_v20  ;;  %v1264_v3 = vmul.f32 0.6931472, %v1626_v1 }
 0x591   :  { %1295 = vst [vmem:[#allocation16 + $0x70] sm:$0xff] %v1279_v0 }
 0x592   :  { %v1280_v16 = vsub.f32 %v2368_v41, %v1264_v3 }
 0x594   :  { %1296 = vst [vmem:[#allocation16 + $0x78] sm:$0xff] %v1280_v16 }
 0x595   :  { %1814 = shalt.err (!%p1811_p12)
}
 0x596   :  { %s1815_s13 = scalar_lea.hbm %s2408_s8, 2048 }
 0x597   :  { %p1816_p13 = scmp.ne.s32.totalorder %s2408_s8, %s1815_s13  ;;  %p1819_p0 = scmp.lt.u32.totalorder %s1815_s13, %s2408_s8 }
 0x599   :  { %p1821_p1 = pnand %p1819_p0, %p1816_p13 }
 0x59b   :  { %1824 = shalt.err (!%p1821_p1)
}
 0x59c   :  { %s1850_s23 = smov 128   ;;  %s1851_s3 = smov 8  }
 0x59d   :  { %1308 = dma.vmem_to_hbm [thread:$0]  %s1303_s15, 2048, %s2408_s8, [#allocation4], %s1850_s23, %s1850_s23, %s1851_s3  }
 0x59e   :  { %1835 = dma.done.wait [#allocation4], 2048  }
 0x59f   :  { %1836 = vsyncadd [#allocation4], 4294965248 }
 0x5a0   :  { %1312 = vsyncpa [#allocation3], 1 }
 0x5a1   :  { %1313 = vsyncpa [#allocation6], 1 }
 0x5a2   :  { %1314 = vsyncpa [#allocation9], 1 }
 0x5a3   :  { %1315 = vsyncpa [#allocation12], 1 }
 0x5a4   :  { %1316 = vsyncpa [#allocation15], 1 }
 0x5a5   :  { %1317 = vsyncpa [#allocation4], 1 }

</bundles_post_ra>
